<compile_context>
chip_gen: v7x
topology: tpu7x:2x2x1
jax: 0.10.0
libtpu: 0.0.40
codegen_flags: <defaults>
</compile_context>

<pallas_src>
import functools
import math

import jax
import jax.numpy as jnp
from jax.experimental import pallas as pl
from jax.experimental.pallas import tpu as pltpu

EPS = 1e-6
MASK_VALUE = -2e9  # float32 path of the torch module (-2000000000.0)


def _fast_recip(x):
    # Approximate reciprocal on the EUP + one Newton-Raphson step (near-f32 accuracy).
    r = pl.reciprocal(x, approx=True)
    return r * (2.0 - x * r)


def _layernorm(x, alpha, bias):
    # torch LayerNormalization: alpha * (x - mean) / (std + eps) + bias
    # torch .std() is the UNBIASED std (divide by N-1); eps is added to std.
    d = x.shape[-1]
    mean = jnp.mean(x, axis=-1, keepdims=True)
    diff = x - mean
    var = jnp.sum(diff * diff, axis=-1, keepdims=True) * (1.0 / (d - 1))
    std = jnp.sqrt(var)
    return alpha * diff * _fast_recip(std + EPS) + bias


# ------------------------------- kernel ---------------------------------------

def _encoder_block_kernel(h, tq, apply_final_ln, cd,
                          x_ref, mask_ref, wqkv_ref, wo_ref,
                          ln1_a_ref, ln1_b_ref, ln2_a_ref, ln2_b_ref,
                          w1_ref, b1_ref, w2_ref, b2_ref,
                          lnf_a_ref, lnf_b_ref,
                          o_ref,
                          q_scr, k_scr, v_scr):
    S, D = x_ref.shape[1], x_ref.shape[2]
    d_k = D // h
    qi = pl.program_id(1)

    # ---- pre-norm + fused QKV projection: computed ONCE per batch row, reused
    # across all query tiles (scratch persists across the "arbitrary" qi axis). ----
    @pl.when(qi == 0)
    def _():
        xn = _layernorm(x_ref[0], ln1_a_ref[...], ln1_b_ref[...])           # (S, D) f32
        qkv = jnp.dot(xn.astype(cd), wqkv_ref[...],
                      preferred_element_type=jnp.float32)                   # (S, 3D) f32
        # Store head-major so per-tile attention needs no q/k/v transposes.
        q_scr[...] = jnp.swapaxes(qkv[:, :D].reshape(S, h, d_k), 0, 1).astype(cd)
        k_scr[...] = jnp.swapaxes(qkv[:, D:2 * D].reshape(S, h, d_k), 0, 1).astype(cd)
        v_scr[...] = jnp.swapaxes(qkv[:, 2 * D:].reshape(S, h, d_k), 0, 1).astype(cd)

    q_start = pl.multiple_of(qi * tq, tq)
    xq = x_ref[0, pl.ds(q_start, tq), :]                                    # (tq, D) f32 residual

    mask = mask_ref[0]                                                      # (1, S)
    neg = (mask == 0)[None, :, :]                                           # (1, 1, S)

    # ---- batched multi-head attention (1/sqrt(d_k) already folded into wq) ----
    qh = q_scr[:, pl.ds(q_start, tq), :]                                    # (h, tq, d_k)
    kh = k_scr[...]                                                         # (h, S,  d_k)
    vh = v_scr[...]                                                         # (h, S,  d_k)

    scores = jnp.einsum('hqd,hkd->hqk', qh, kh,
                        preferred_element_type=jnp.float32)                 # (h, tq, S) f32
    scores = jnp.where(neg, MASK_VALUE, scores)
    scores = scores - jnp.max(scores, axis=-1, keepdims=True)
    p = jnp.exp(scores)
    p = p * _fast_recip(jnp.sum(p, axis=-1, keepdims=True))

    ctx = jnp.einsum('hqk,hkd->hqd', p.astype(cd), vh,
                     preferred_element_type=jnp.float32)                    # (h, tq, d_k)
    ctx = jnp.swapaxes(ctx, 0, 1).reshape(tq, D)                            # (tq, D)

    attn = jnp.dot(ctx.astype(cd), wo_ref[...], preferred_element_type=jnp.float32)
    x1 = xq + attn                                                          # residual 1 (f32)

    # ---- residual_connections[1]: pre-norm feed-forward ----
    xn2 = _layernorm(x1, ln2_a_ref[...], ln2_b_ref[...])
    hmid = jnp.dot(xn2.astype(cd), w1_ref[...],
                   preferred_element_type=jnp.float32) + b1_ref[...]
    hmid = jnp.maximum(hmid, 0.0)
    ff = jnp.dot(hmid.astype(cd), w2_ref[...],
                 preferred_element_type=jnp.float32) + b2_ref[...]
    out = x1 + ff                                                           # residual 2 (f32)

    if apply_final_ln:
        # Encoder's trailing LayerNormalization fused into the last block's kernel.
        out = _layernorm(out, lnf_a_ref[...], lnf_b_ref[...])

    o_ref[0] = out.astype(o_ref.dtype)


# ------------------------------- wrapper ---------------------------------------

def _pick_tiling(S, force_tq=None):
    """Returns (padded S, query tile). Padded S is always a multiple of the tile."""
    if force_tq is not None:
        tq = force_tq
    elif S <= 512:
        tq = -(-S // 8) * 8          # single tile, rounded up to a sublane multiple
    else:
        tq = 256                      # large-S query tile (128 also fine on v5e)
    sp = -(-S // tq) * tq
    return sp, tq


def _vmem_ceiling_bytes():
    try:
        return max(int(0.85 * pltpu.get_tpu_info().vmem_capacity_bytes), 32 << 20)
    except Exception:
        return 100 << 20


def _weight_spec(shape):
    # Invariant blocks (constant index map): single-buffer them if supported.
    n = len(shape)
    idx = lambda b, qi: (0,) * n
    buffered = getattr(pl, "Buffered", None)
    if buffered is not None:
        try:
            return pl.BlockSpec(shape, idx, pipeline_mode=buffered(1))
        except TypeError:
            pass
    return pl.BlockSpec(shape, idx)


def encoder_block(x, mask, p, final_ln, h, tq, *, apply_final_ln, compute_dtype):
    B, Sp, D = x.shape
    d_ff = p["w1"].shape[1]
    nq = Sp // tq
    cd = compute_dtype
    it = jnp.dtype(cd).itemsize

    in_specs = [
        pl.BlockSpec((1, Sp, D), lambda b, qi: (b, 0, 0)),     # x (full padded sequence)
        pl.BlockSpec((1, 1, Sp), lambda b, qi: (b, 0, 0)),     # mask
        _weight_spec((D, 3 * D)), _weight_spec((D, D)),        # wqkv, wo
        _weight_spec((1, D)), _weight_spec((1, D)),            # ln1
        _weight_spec((1, D)), _weight_spec((1, D)),            # ln2
        _weight_spec((D, d_ff)), _weight_spec((1, d_ff)),      # w1, b1
        _weight_spec((d_ff, D)), _weight_spec((1, D)),         # w2, b2
        _weight_spec((1, D)), _weight_spec((1, D)),            # final ln
    ]
    d_k = D // h
    scratch = [pltpu.VMEM((h, Sp, d_k), cd) for _ in range(3)]  # q, k, v (head-major)

    # Explicit VMEM budget: blocks (double-buffered x/mask/out), single-buffered
    # weights, q/k/v scratch, plus f32 intermediates (qkv, scores, p, FFN hidden).
    est = (2 * Sp * D * 4 + 2 * Sp * 4 + 2 * tq * D * 4
           + (4 * D * D + 2 * D * d_ff) * it + (8 * D + 2 * d_ff) * 4
           + 3 * Sp * D * it
           + 3 * Sp * D * 4
           + 2 * h * tq * Sp * 4
           + 2 * tq * d_ff * 4 + 6 * tq * D * 4)
    vmem_limit = int(min(max(2 * est, 16 << 20), _vmem_ceiling_bytes()))

    kernel = functools.partial(_encoder_block_kernel, h, tq, apply_final_ln, cd)
    return pl.pallas_call(
        kernel,
        out_shape=jax.ShapeDtypeStruct((B, Sp, D), x.dtype),
        grid=(B, nq),
        in_specs=in_specs,
        out_specs=pl.BlockSpec((1, tq, D), lambda b, qi: (b, qi, 0)),
        scratch_shapes=scratch,
        compiler_params=pltpu.CompilerParams(
            dimension_semantics=("parallel", "arbitrary"),   # qi reuses K/V scratch
            vmem_limit_bytes=vmem_limit),
    )(x, mask, p["wqkv"], p["wo"],
      p["ln1_a"], p["ln1_b"], p["ln2_a"], p["ln2_b"],
      p["w1"], p["b1"], p["w2"], p["b2"],
      final_ln["alpha"], final_ln["bias"])


def prepare_params(layers, final_ln, h, compute_dtype=jnp.bfloat16):
    """One-time prep: fuse QKV (scale folded into Q columns) and pre-cast weights."""
    cd = compute_dtype
    prepped = []
    for p in layers:
        D = p["wq"].shape[0]
        scale = (D // h) ** -0.5
        prepped.append({
            "wqkv": jnp.concatenate([p["wq"] * scale, p["wk"], p["wv"]], axis=1).astype(cd),
            "wo": p["wo"].astype(cd),
            "w1": p["w1"].astype(cd), "b1": p["b1"],
            "w2": p["w2"].astype(cd), "b2": p["b2"],
            "ln1_a": p["ln1_a"], "ln1_b": p["ln1_b"],
            "ln2_a": p["ln2_a"], "ln2_b": p["ln2_b"],
        })
    return {"layers": prepped, "final_ln": final_ln, "compute_dtype": cd}


def encoder_forward(x, mask, prepared, h, *, force_tq=None):
    layers = prepared["layers"]
    final_ln = prepared["final_ln"]
    cd = prepared["compute_dtype"]
    B, S, D = x.shape
    sp, tq = _pick_tiling(S, force_tq)
    if sp != S:
        x = jnp.pad(x, ((0, 0), (0, sp - S), (0, 0)))
        mask = jnp.pad(mask, ((0, 0), (0, 0), (0, sp - S)))   # padded keys masked out
    n = len(layers)
    for i, p in enumerate(layers):
        x = encoder_block(x, mask, p, final_ln, h, tq,
                          apply_final_ln=(i == n - 1), compute_dtype=cd)
    return x[:, :S, :] if sp != S else x


# --------------------------- parameter construction ---------------------------

def xavier_uniform(key, shape):
    fan_in, fan_out = shape
    a = math.sqrt(6.0 / (fan_in + fan_out))
    return jax.random.uniform(key, shape, jnp.float32, -a, a)


def init_params(key, d_model, N, h, d_ff):
    layers = []
    for _ in range(N):
        key, *ks = jax.random.split(key, 10)
        layers.append({
            "wq": xavier_uniform(ks[0], (d_model, d_model)),
            "wk": xavier_uniform(ks[1], (d_model, d_model)),
            "wv": xavier_uniform(ks[2], (d_model, d_model)),
            "wo": xavier_uniform(ks[3], (d_model, d_model)),
            "w1": xavier_uniform(ks[4], (d_model, d_ff)),
            "b1": jax.random.uniform(ks[5], (1, d_ff), jnp.float32,
                                     -1.0 / math.sqrt(d_model), 1.0 / math.sqrt(d_model)),
            "w2": xavier_uniform(ks[6], (d_ff, d_model)),
            "b2": jax.random.uniform(ks[7], (1, d_model), jnp.float32,
                                     -1.0 / math.sqrt(d_ff), 1.0 / math.sqrt(d_ff)),
            "ln1_a": jnp.ones((1, d_model), jnp.float32),
            "ln1_b": jnp.zeros((1, d_model), jnp.float32),
            "ln2_a": jnp.ones((1, d_model), jnp.float32),
            "ln2_b": jnp.zeros((1, d_model), jnp.float32),
        })
    final_ln = {"alpha": jnp.ones((1, d_model), jnp.float32),
                "bias": jnp.zeros((1, d_model), jnp.float32)}
    return layers, final_ln


# ------------------------------ pure-JAX reference ----------------------------

def reference_forward(x, mask, layers, final_ln, h):
    def ln(y, a, b):
        mean = y.mean(-1, keepdims=True)
        std = jnp.sqrt(((y - mean) ** 2).sum(-1, keepdims=True) / (y.shape[-1] - 1))
        return a * (y - mean) / (std + EPS) + b

    B, S, D = x.shape
    dk = D // h
    dot = functools.partial(jnp.matmul, precision=jax.lax.Precision.HIGHEST)
    for p in layers:
        xn = ln(x, p["ln1_a"], p["ln1_b"])
        q = dot(xn, p["wq"]).reshape(B, S, h, dk).transpose(0, 2, 1, 3)
        k = dot(xn, p["wk"]).reshape(B, S, h, dk).transpose(0, 2, 1, 3)
        v = dot(xn, p["wv"]).reshape(B, S, h, dk).transpose(0, 2, 1, 3)
        scores = dot(q, jnp.swapaxes(k, -1, -2)) * dk ** -0.5
        scores = jnp.where(mask[:, None, :, :] == 0, MASK_VALUE, scores)
        scores = jax.nn.softmax(scores, axis=-1)
        a = dot(scores, v).transpose(0, 2, 1, 3).reshape(B, S, D)
        x = x + dot(a, p["wo"])
        xn2 = ln(x, p["ln2_a"], p["ln2_b"])
        ff = dot(jnp.maximum(dot(xn2, p["w1"]) + p["b1"], 0.0), p["w2"]) + p["b2"]
        x = x + ff
    return ln(x, final_ln["alpha"], final_ln["bias"])


# ------------------------------------ main -------------------------------------

if __name__ == "__main__":
    B, D, H, D_FF, N = 2, 32, 4, 64, 2   # small but representative shapes

    key = jax.random.PRNGKey(0)
    k_params, k_data = jax.random.split(key)
    layers, final_ln = init_params(k_params, D, N, H, D_FF)

    prep_f32 = prepare_params(layers, final_ln, H, compute_dtype=jnp.float32)
    prep_bf16 = prepare_params(layers, final_ln, H, compute_dtype=jnp.bfloat16)

    def run_case(name, S, prep, force_tq, atol, rtol):
        kx = jax.random.fold_in(k_data, S * 131 + (0 if force_tq is None else force_tq))
        x = jax.random.normal(kx, (B, S, D), jnp.float32)
        mask = jnp.ones((B, 1, S), jnp.float32)
        mask = mask.at[1, 0, -2:].set(0.0)   # mask last two key positions of item 1
        out = jax.block_until_ready(encoder_forward(x, mask, prep, H, force_tq=force_tq))
        ref = reference_forward(x, mask, layers, final_ln, H)
        assert out.shape == (B, S, D), f"{name}: bad shape {out.shape}"
        err = jnp.max(jnp.abs(out.astype(jnp.float32) - ref))
        assert jnp.allclose(out.astype(jnp.float32), ref, atol=atol, rtol=rtol), \
            f"{name}: max abs err = {err}"

    # f32 matmul path, single query tile.
    run_case("f32 single-tile", 8, prep_f32, None, 2e-3, 2e-3)
    # f32, multi query tiles (exercises the persistent K/V scratch reuse path).
    run_case("f32 multi-tile", 32, prep_f32, 8, 2e-3, 2e-3)
    # f32, non-multiple-of-8 sequence (exercises the padding path).
    run_case("f32 padded-seq", 13, prep_f32, None, 2e-3, 2e-3)
    # bf16 matmul-input path (f32 accumulation / f32 LN, softmax, residuals).
    run_case("bf16 single-tile", 8, prep_bf16, None, 2.5e-1, 1e-1)

    print("KERNEL_OK")
</pallas_src>

<mosaic_0001>
module attributes {stable_mosaic.version = 11 : i64} {
  func.func @_encoder_block_kernel(%arg0: i32, %arg1: i32, %arg2: memref<1x8x32xf32, #tpu.memory_space<vmem>>, %arg3: memref<1x1x8xf32, #tpu.memory_space<vmem>>, %arg4: memref<32x96xf32, #tpu.memory_space<vmem>>, %arg5: memref<32x32xf32, #tpu.memory_space<vmem>>, %arg6: memref<1x32xf32, #tpu.memory_space<vmem>>, %arg7: memref<1x32xf32, #tpu.memory_space<vmem>>, %arg8: memref<1x32xf32, #tpu.memory_space<vmem>>, %arg9: memref<1x32xf32, #tpu.memory_space<vmem>>, %arg10: memref<32x64xf32, #tpu.memory_space<vmem>>, %arg11: memref<1x64xf32, #tpu.memory_space<vmem>>, %arg12: memref<64x32xf32, #tpu.memory_space<vmem>>, %arg13: memref<1x32xf32, #tpu.memory_space<vmem>>, %arg14: memref<1x32xf32, #tpu.memory_space<vmem>>, %arg15: memref<1x32xf32, #tpu.memory_space<vmem>>, %arg16: memref<1x8x32xf32, #tpu.memory_space<vmem>>, %arg17: memref<4x8x8xf32, #tpu.memory_space<vmem>>, %arg18: memref<4x8x8xf32, #tpu.memory_space<vmem>>, %arg19: memref<4x8x8xf32, #tpu.memory_space<vmem>>) attributes {dimension_semantics = [#tpu.dimension_semantics<parallel>, #tpu.dimension_semantics<arbitrary>], iteration_bounds = array<i64: 2, 1>, scalar_prefetch = 0 : i64, scratch_operands = 3 : i64, tpu.core_type = #tpu.core_type<tc>, window_params = [{transform_indices = @transform_0, window_bounds = array<i64: 1, 8, 32>}, {transform_indices = @transform_1, window_bounds = array<i64: 1, 1, 8>}, {pipeline_mode = #tpu.pipeline_mode<synchronous>, transform_indices = @transform_2, window_bounds = array<i64: 32, 96>}, {pipeline_mode = #tpu.pipeline_mode<synchronous>, transform_indices = @transform_3, window_bounds = array<i64: 32, 32>}, {pipeline_mode = #tpu.pipeline_mode<synchronous>, transform_indices = @transform_4, window_bounds = array<i64: 1, 32>}, {pipeline_mode = #tpu.pipeline_mode<synchronous>, transform_indices = @transform_5, window_bounds = array<i64: 1, 32>}, {pipeline_mode = #tpu.pipeline_mode<synchronous>, transform_indices = @transform_6, window_bounds = array<i64: 1, 32>}, {pipeline_mode = #tpu.pipeline_mode<synchronous>, transform_indices = @transform_7, window_bounds = array<i64: 1, 32>}, {pipeline_mode = #tpu.pipeline_mode<synchronous>, transform_indices = @transform_8, window_bounds = array<i64: 32, 64>}, {pipeline_mode = #tpu.pipeline_mode<synchronous>, transform_indices = @transform_9, window_bounds = array<i64: 1, 64>}, {pipeline_mode = #tpu.pipeline_mode<synchronous>, transform_indices = @transform_10, window_bounds = array<i64: 64, 32>}, {pipeline_mode = #tpu.pipeline_mode<synchronous>, transform_indices = @transform_11, window_bounds = array<i64: 1, 32>}, {pipeline_mode = #tpu.pipeline_mode<synchronous>, transform_indices = @transform_12, window_bounds = array<i64: 1, 32>}, {pipeline_mode = #tpu.pipeline_mode<synchronous>, transform_indices = @transform_13, window_bounds = array<i64: 1, 32>}, {transform_indices = @transform_14, window_bounds = array<i64: 1, 8, 32>}]} {
    %c0_i32 = arith.constant 0 : i32
    %0 = arith.cmpi eq, %arg1, %c0_i32 : i32
    %1 = arith.extui %0 : i1 to i32
    %c0_i32_0 = arith.constant 0 : i32
    %2 = arith.cmpi ne, %1, %c0_i32_0 : i32
    scf.if %2 {
      %c0_46 = arith.constant 0 : index
      %c0_47 = arith.constant 0 : index
      %c0_48 = arith.constant 0 : index
      %85 = vector.load %arg2[%c0_46, %c0_47, %c0_48] : memref<1x8x32xf32, #tpu.memory_space<vmem>>, vector<1x8x32xf32>
      %86 = vector.shape_cast %85 : vector<1x8x32xf32> to vector<8x32xf32>
      %c0_49 = arith.constant 0 : index
      %c0_50 = arith.constant 0 : index
      %87 = vector.load %arg6[%c0_49, %c0_50] : memref<1x32xf32, #tpu.memory_space<vmem>>, vector<1x32xf32>
      %c0_51 = arith.constant 0 : index
      %c0_52 = arith.constant 0 : index
      %88 = vector.load %arg7[%c0_51, %c0_52] : memref<1x32xf32, #tpu.memory_space<vmem>>, vector<1x32xf32>
      %cst_53 = arith.constant dense<0.000000e+00> : vector<8xf32>
      %89 = vector.multi_reduction <add>, %86, %cst_53 [1] : vector<8x32xf32> to vector<8xf32>
      %90 = vector.shape_cast %89 : vector<8xf32> to vector<8x1xf32>
      %cst_54 = arith.constant 3.200000e+01 : f32
      %91 = vector.broadcast %cst_54 : f32 to vector<8x1xf32>
      %92 = arith.divf %90, %91 : vector<8x1xf32>
      %93 = vector.broadcast %92 : vector<8x1xf32> to vector<8x32xf32>
      %94 = arith.subf %86, %93 : vector<8x32xf32>
      %95 = arith.mulf %94, %94 : vector<8x32xf32>
      %cst_55 = arith.constant dense<0.000000e+00> : vector<8xf32>
      %96 = vector.multi_reduction <add>, %95, %cst_55 [1] : vector<8x32xf32> to vector<8xf32>
      %97 = vector.shape_cast %96 : vector<8xf32> to vector<8x1xf32>
      %cst_56 = arith.constant 0.0322580636 : f32
      %98 = vector.broadcast %cst_56 : f32 to vector<8x1xf32>
      %99 = arith.mulf %97, %98 : vector<8x1xf32>
      %100 = math.sqrt %99 : vector<8x1xf32>
      %101 = vector.broadcast %87 : vector<1x32xf32> to vector<8x32xf32>
      %102 = arith.mulf %101, %94 : vector<8x32xf32>
      %cst_57 = arith.constant 9.99999997E-7 : f32
      %103 = vector.broadcast %cst_57 : f32 to vector<8x1xf32>
      %104 = arith.addf %100, %103 : vector<8x1xf32>
      %105 = tpu.reciprocal %104 {approx = true} : vector<8x1xf32> -> vector<8x1xf32>
      %106 = arith.mulf %104, %105 : vector<8x1xf32>
      %cst_58 = arith.constant 2.000000e+00 : f32
      %107 = vector.broadcast %cst_58 : f32 to vector<8x1xf32>
      %108 = arith.subf %107, %106 : vector<8x1xf32>
      %109 = arith.mulf %105, %108 : vector<8x1xf32>
      %110 = vector.broadcast %109 : vector<8x1xf32> to vector<8x32xf32>
      %111 = arith.mulf %102, %110 : vector<8x32xf32>
      %112 = vector.broadcast %88 : vector<1x32xf32> to vector<8x32xf32>
      %113 = arith.addf %111, %112 : vector<8x32xf32>
      %c0_59 = arith.constant 0 : index
      %c0_60 = arith.constant 0 : index
      %114 = vector.load %arg4[%c0_59, %c0_60] : memref<32x96xf32, #tpu.memory_space<vmem>>, vector<32x96xf32>
      %cst_61 = arith.constant dense<0.000000e+00> : vector<8x96xf32>
      %115 = tpu.matmul %113, %114, %cst_61 {dimension_numbers = #tpu.dot_dimension_numbers<[1], [0], [0], [1], [0, 0, 1, 1], [], []>} : vector<8x32xf32>, vector<32x96xf32>, vector<8x96xf32> -> vector<8x96xf32>
      %116 = vector.extract_strided_slice %115 {offsets = [0, 0], sizes = [8, 32], strides = [1, 1]} : vector<8x96xf32> to vector<8x32xf32>
      %117 = vector.shape_cast %116 : vector<8x32xf32> to vector<8x4x8xf32>
      %118 = tpu.transpose %117, [1, 0, 2] : vector<8x4x8xf32> -> vector<4x8x8xf32>
      %c0_62 = arith.constant 0 : index
      %c0_63 = arith.constant 0 : index
      %c0_64 = arith.constant 0 : index
      %119 = vector.load %arg17[%c0_62, %c0_63, %c0_64] : memref<4x8x8xf32, #tpu.memory_space<vmem>>, vector<4x8x8xf32>
      tpu.vector_store %arg17[%c0_62, %c0_63, %c0_64], %118 {strides = array<i32>} : memref<4x8x8xf32, #tpu.memory_space<vmem>>, vector<4x8x8xf32>,
      %120 = vector.extract_strided_slice %115 {offsets = [0, 32], sizes = [8, 32], strides = [1, 1]} : vector<8x96xf32> to vector<8x32xf32>
      %121 = vector.shape_cast %120 : vector<8x32xf32> to vector<8x4x8xf32>
      %122 = tpu.transpose %121, [1, 0, 2] : vector<8x4x8xf32> -> vector<4x8x8xf32>
      %c0_65 = arith.constant 0 : index
      %c0_66 = arith.constant 0 : index
      %c0_67 = arith.constant 0 : index
      %123 = vector.load %arg18[%c0_65, %c0_66, %c0_67] : memref<4x8x8xf32, #tpu.memory_space<vmem>>, vector<4x8x8xf32>
      tpu.vector_store %arg18[%c0_65, %c0_66, %c0_67], %122 {strides = array<i32>} : memref<4x8x8xf32, #tpu.memory_space<vmem>>, vector<4x8x8xf32>,
      %124 = vector.extract_strided_slice %115 {offsets = [0, 64], sizes = [8, 32], strides = [1, 1]} : vector<8x96xf32> to vector<8x32xf32>
      %125 = vector.shape_cast %124 : vector<8x32xf32> to vector<8x4x8xf32>
      %126 = tpu.transpose %125, [1, 0, 2] : vector<8x4x8xf32> -> vector<4x8x8xf32>
      %c0_68 = arith.constant 0 : index
      %c0_69 = arith.constant 0 : index
      %c0_70 = arith.constant 0 : index
      %127 = vector.load %arg19[%c0_68, %c0_69, %c0_70] : memref<4x8x8xf32, #tpu.memory_space<vmem>>, vector<4x8x8xf32>
      tpu.vector_store %arg19[%c0_68, %c0_69, %c0_70], %126 {strides = array<i32>} : memref<4x8x8xf32, #tpu.memory_space<vmem>>, vector<4x8x8xf32>,
    } else {
    }
    %c8_i32 = arith.constant 8 : i32
    %3 = arith.muli %arg1, %c8_i32 : i32
    %4 = tpu.assume_multiple %3, 8 : i32
    %c0 = arith.constant 0 : index
    %5 = arith.index_cast %4 : i32 to index
    %c0_1 = arith.constant 0 : index
    %6 = vector.load %arg2[%c0, %5, %c0_1] : memref<1x8x32xf32, #tpu.memory_space<vmem>>, vector<1x8x32xf32>
    %7 = vector.shape_cast %6 : vector<1x8x32xf32> to vector<8x32xf32>
    %c0_2 = arith.constant 0 : index
    %c0_3 = arith.constant 0 : index
    %c0_4 = arith.constant 0 : index
    %8 = vector.load %arg3[%c0_2, %c0_3, %c0_4] : memref<1x1x8xf32, #tpu.memory_space<vmem>>, vector<1x1x8xf32>
    %9 = vector.shape_cast %8 : vector<1x1x8xf32> to vector<1x8xf32>
    %cst = arith.constant 0.000000e+00 : f32
    %10 = vector.broadcast %cst : f32 to vector<1x8xf32>
    %11 = arith.cmpf oeq, %9, %10 : vector<1x8xf32>
    %12 = vector.shape_cast %11 : vector<1x8xi1> to vector<1x1x8xi1>
    %c0_5 = arith.constant 0 : index
    %13 = arith.index_cast %4 : i32 to index
    %c0_6 = arith.constant 0 : index
    %14 = vector.load %arg17[%c0_5, %13, %c0_6] : memref<4x8x8xf32, #tpu.memory_space<vmem>>, vector<4x8x8xf32>
    %c0_7 = arith.constant 0 : index
    %c0_8 = arith.constant 0 : index
    %c0_9 = arith.constant 0 : index
    %15 = vector.load %arg18[%c0_7, %c0_8, %c0_9] : memref<4x8x8xf32, #tpu.memory_space<vmem>>, vector<4x8x8xf32>
    %c0_10 = arith.constant 0 : index
    %c0_11 = arith.constant 0 : index
    %c0_12 = arith.constant 0 : index
    %16 = vector.load %arg19[%c0_10, %c0_11, %c0_12] : memref<4x8x8xf32, #tpu.memory_space<vmem>>, vector<4x8x8xf32>
    "tpu.trace_start"() <{level = 10 : i32, message = "hqd,hkd->hqk"}> : () -> ()
    %cst_13 = arith.constant dense<0.000000e+00> : vector<4x8x8xf32>
    %17 = tpu.matmul %14, %15, %cst_13 {dimension_numbers = #tpu.dot_dimension_numbers<[2], [2], [1], [1], [0, 0, 0, 1, 1, 1], [0], [0]>} : vector<4x8x8xf32>, vector<4x8x8xf32>, vector<4x8x8xf32> -> vector<4x8x8xf32>
    %cst_14 = arith.constant -2.000000e+09 : f32
    "tpu.trace_stop"() : () -> ()
    %18 = vector.shape_cast %12 : vector<1x1x8xi1> to vector<1x1x8xi1>
    %19 = vector.broadcast %18 : vector<1x1x8xi1> to vector<4x8x8xi1>
    %20 = vector.broadcast %cst_14 : f32 to vector<4x8x8xf32>
    %21 = arith.select %19, %20, %17 : vector<4x8x8xi1>, vector<4x8x8xf32>
    %cst_15 = arith.constant dense<0xFF800000> : vector<4x8xf32>
    %22 = vector.multi_reduction <maximumf>, %21, %cst_15 [2] : vector<4x8x8xf32> to vector<4x8xf32>
    %23 = vector.shape_cast %22 : vector<4x8xf32> to vector<4x8x1xf32>
    %24 = vector.broadcast %23 : vector<4x8x1xf32> to vector<4x8x8xf32>
    %25 = arith.subf %21, %24 : vector<4x8x8xf32>
    %26 = math.exp %25 : vector<4x8x8xf32>
    %cst_16 = arith.constant dense<0.000000e+00> : vector<4x8xf32>
    %27 = vector.multi_reduction <add>, %26, %cst_16 [2] : vector<4x8x8xf32> to vector<4x8xf32>
    %28 = vector.shape_cast %27 : vector<4x8xf32> to vector<4x8x1xf32>
    %29 = tpu.reciprocal %28 {approx = true} : vector<4x8x1xf32> -> vector<4x8x1xf32>
    %30 = arith.mulf %28, %29 : vector<4x8x1xf32>
    %cst_17 = arith.constant 2.000000e+00 : f32
    %31 = vector.broadcast %cst_17 : f32 to vector<4x8x1xf32>
    %32 = arith.subf %31, %30 : vector<4x8x1xf32>
    %33 = arith.mulf %29, %32 : vector<4x8x1xf32>
    %34 = vector.broadcast %33 : vector<4x8x1xf32> to vector<4x8x8xf32>
    %35 = arith.mulf %26, %34 : vector<4x8x8xf32>
    "tpu.trace_start"() <{level = 10 : i32, message = "hqk,hkd->hqd"}> : () -> ()
    %cst_18 = arith.constant dense<0.000000e+00> : vector<4x8x8xf32>
    %36 = tpu.matmul %35, %16, %cst_18 {dimension_numbers = #tpu.dot_dimension_numbers<[2], [1], [1], [2], [0, 0, 0, 1, 1, 2], [0], [0]>} : vector<4x8x8xf32>, vector<4x8x8xf32>, vector<4x8x8xf32> -> vector<4x8x8xf32>
    "tpu.trace_stop"() : () -> ()
    %37 = tpu.transpose %36, [1, 0, 2] : vector<4x8x8xf32> -> vector<8x4x8xf32>
    %38 = vector.shape_cast %37 : vector<8x4x8xf32> to vector<8x32xf32>
    %c0_19 = arith.constant 0 : index
    %c0_20 = arith.constant 0 : index
    %39 = vector.load %arg5[%c0_19, %c0_20] : memref<32x32xf32, #tpu.memory_space<vmem>>, vector<32x32xf32>
    %cst_21 = arith.constant dense<0.000000e+00> : vector<8x32xf32>
    %40 = tpu.matmul %38, %39, %cst_21 {dimension_numbers = #tpu.dot_dimension_numbers<[1], [0], [0], [1], [0, 0, 1, 1], [], []>} : vector<8x32xf32>, vector<32x32xf32>, vector<8x32xf32> -> vector<8x32xf32>
    %41 = arith.addf %7, %40 : vector<8x32xf32>
    %c0_22 = arith.constant 0 : index
    %c0_23 = arith.constant 0 : index
    %42 = vector.load %arg8[%c0_22, %c0_23] : memref<1x32xf32, #tpu.memory_space<vmem>>, vector<1x32xf32>
    %c0_24 = arith.constant 0 : index
    %c0_25 = arith.constant 0 : index
    %43 = vector.load %arg9[%c0_24, %c0_25] : memref<1x32xf32, #tpu.memory_space<vmem>>, vector<1x32xf32>
    %cst_26 = arith.constant dense<0.000000e+00> : vector<8xf32>
    %44 = vector.multi_reduction <add>, %41, %cst_26 [1] : vector<8x32xf32> to vector<8xf32>
    %45 = vector.shape_cast %44 : vector<8xf32> to vector<8x1xf32>
    %cst_27 = arith.constant 3.200000e+01 : f32
    %46 = vector.broadcast %cst_27 : f32 to vector<8x1xf32>
    %47 = arith.divf %45, %46 : vector<8x1xf32>
    %48 = vector.broadcast %47 : vector<8x1xf32> to vector<8x32xf32>
    %49 = arith.subf %41, %48 : vector<8x32xf32>
    %50 = arith.mulf %49, %49 : vector<8x32xf32>
    %cst_28 = arith.constant dense<0.000000e+00> : vector<8xf32>
    %51 = vector.multi_reduction <add>, %50, %cst_28 [1] : vector<8x32xf32> to vector<8xf32>
    %52 = vector.shape_cast %51 : vector<8xf32> to vector<8x1xf32>
    %cst_29 = arith.constant 0.0322580636 : f32
    %53 = vector.broadcast %cst_29 : f32 to vector<8x1xf32>
    %54 = arith.mulf %52, %53 : vector<8x1xf32>
    %55 = math.sqrt %54 : vector<8x1xf32>
    %56 = vector.broadcast %42 : vector<1x32xf32> to vector<8x32xf32>
    %57 = arith.mulf %56, %49 : vector<8x32xf32>
    %cst_30 = arith.constant 9.99999997E-7 : f32
    %58 = vector.broadcast %cst_30 : f32 to vector<8x1xf32>
    %59 = arith.addf %55, %58 : vector<8x1xf32>
    %60 = tpu.reciprocal %59 {approx = true} : vector<8x1xf32> -> vector<8x1xf32>
    %61 = arith.mulf %59, %60 : vector<8x1xf32>
    %cst_31 = arith.constant 2.000000e+00 : f32
    %62 = vector.broadcast %cst_31 : f32 to vector<8x1xf32>
    %63 = arith.subf %62, %61 : vector<8x1xf32>
    %64 = arith.mulf %60, %63 : vector<8x1xf32>
    %65 = vector.broadcast %64 : vector<8x1xf32> to vector<8x32xf32>
    %66 = arith.mulf %57, %65 : vector<8x32xf32>
    %67 = vector.broadcast %43 : vector<1x32xf32> to vector<8x32xf32>
    %68 = arith.addf %66, %67 : vector<8x32xf32>
    %c0_32 = arith.constant 0 : index
    %c0_33 = arith.constant 0 : index
    %69 = vector.load %arg10[%c0_32, %c0_33] : memref<32x64xf32, #tpu.memory_space<vmem>>, vector<32x64xf32>
    %cst_34 = arith.constant dense<0.000000e+00> : vector<8x64xf32>
    %70 = tpu.matmul %68, %69, %cst_34 {dimension_numbers = #tpu.dot_dimension_numbers<[1], [0], [0], [1], [0, 0, 1, 1], [], []>} : vector<8x32xf32>, vector<32x64xf32>, vector<8x64xf32> -> vector<8x64xf32>
    %c0_35 = arith.constant 0 : index
    %c0_36 = arith.constant 0 : index
    %71 = vector.load %arg11[%c0_35, %c0_36] : memref<1x64xf32, #tpu.memory_space<vmem>>, vector<1x64xf32>
    %72 = vector.broadcast %71 : vector<1x64xf32> to vector<8x64xf32>
    %73 = arith.addf %70, %72 : vector<8x64xf32>
    %cst_37 = arith.constant 0.000000e+00 : f32
    %74 = vector.broadcast %cst_37 : f32 to vector<8x64xf32>
    %75 = arith.maximumf %73, %74 : vector<8x64xf32>
    %c0_38 = arith.constant 0 : index
    %c0_39 = arith.constant 0 : index
    %76 = vector.load %arg12[%c0_38, %c0_39] : memref<64x32xf32, #tpu.memory_space<vmem>>, vector<64x32xf32>
    %cst_40 = arith.constant dense<0.000000e+00> : vector<8x32xf32>
    %77 = tpu.matmul %75, %76, %cst_40 {dimension_numbers = #tpu.dot_dimension_numbers<[1], [0], [0], [1], [0, 0, 1, 1], [], []>} : vector<8x64xf32>, vector<64x32xf32>, vector<8x32xf32> -> vector<8x32xf32>
    %c0_41 = arith.constant 0 : index
    %c0_42 = arith.constant 0 : index
    %78 = vector.load %arg13[%c0_41, %c0_42] : memref<1x32xf32, #tpu.memory_space<vmem>>, vector<1x32xf32>
    %79 = vector.broadcast %78 : vector<1x32xf32> to vector<8x32xf32>
    %80 = arith.addf %77, %79 : vector<8x32xf32>
    %81 = arith.addf %41, %80 : vector<8x32xf32>
    %c0_43 = arith.constant 0 : index
    %c0_44 = arith.constant 0 : index
    %c0_45 = arith.constant 0 : index
    %82 = vector.load %arg16[%c0_43, %c0_44, %c0_45] : memref<1x8x32xf32, #tpu.memory_space<vmem>>, vector<1x8x32xf32>
    %83 = vector.shape_cast %82 : vector<1x8x32xf32> to vector<8x32xf32>
    %84 = vector.shape_cast %81 : vector<8x32xf32> to vector<1x8x32xf32>
    tpu.vector_store %arg16[%c0_43, %c0_44, %c0_45], %84 {strides = array<i32>} : memref<1x8x32xf32, #tpu.memory_space<vmem>>, vector<1x8x32xf32>,
    return
  }
  func.func @transform_0(%arg0: i32, %arg1: i32) -> (i32, i32, i32) {
    %c0_i32 = arith.constant 0 : i32
    %c0_i32_0 = arith.constant 0 : i32
    %c0_i32_1 = arith.constant 0 : i32
    return %arg0, %c0_i32, %c0_i32_0 : i32, i32, i32
  }
  func.func @transform_1(%arg0: i32, %arg1: i32) -> (i32, i32, i32) {
    %c0_i32 = arith.constant 0 : i32
    %c0_i32_0 = arith.constant 0 : i32
    %c0_i32_1 = arith.constant 0 : i32
    return %arg0, %c0_i32, %c0_i32_0 : i32, i32, i32
  }
  func.func @transform_2(%arg0: i32, %arg1: i32) -> (i32, i32) {
    %c0_i32 = arith.constant 0 : i32
    %c0_i32_0 = arith.constant 0 : i32
    %c0_i32_1 = arith.constant 0 : i32
    return %c0_i32, %c0_i32_0 : i32, i32
  }
  func.func @transform_3(%arg0: i32, %arg1: i32) -> (i32, i32) {
    %c0_i32 = arith.constant 0 : i32
    %c0_i32_0 = arith.constant 0 : i32
    %c0_i32_1 = arith.constant 0 : i32
    return %c0_i32, %c0_i32_0 : i32, i32
  }
  func.func @transform_4(%arg0: i32, %arg1: i32) -> (i32, i32) {
    %c0_i32 = arith.constant 0 : i32
    %c0_i32_0 = arith.constant 0 : i32
    %c0_i32_1 = arith.constant 0 : i32
    return %c0_i32, %c0_i32_0 : i32, i32
  }
  func.func @transform_5(%arg0: i32, %arg1: i32) -> (i32, i32) {
    %c0_i32 = arith.constant 0 : i32
    %c0_i32_0 = arith.constant 0 : i32
    %c0_i32_1 = arith.constant 0 : i32
    return %c0_i32, %c0_i32_0 : i32, i32
  }
  func.func @transform_6(%arg0: i32, %arg1: i32) -> (i32, i32) {
    %c0_i32 = arith.constant 0 : i32
    %c0_i32_0 = arith.constant 0 : i32
    %c0_i32_1 = arith.constant 0 : i32
    return %c0_i32, %c0_i32_0 : i32, i32
  }
  func.func @transform_7(%arg0: i32, %arg1: i32) -> (i32, i32) {
    %c0_i32 = arith.constant 0 : i32
    %c0_i32_0 = arith.constant 0 : i32
    %c0_i32_1 = arith.constant 0 : i32
    return %c0_i32, %c0_i32_0 : i32, i32
  }
  func.func @transform_8(%arg0: i32, %arg1: i32) -> (i32, i32) {
    %c0_i32 = arith.constant 0 : i32
    %c0_i32_0 = arith.constant 0 : i32
    %c0_i32_1 = arith.constant 0 : i32
    return %c0_i32, %c0_i32_0 : i32, i32
  }
  func.func @transform_9(%arg0: i32, %arg1: i32) -> (i32, i32) {
    %c0_i32 = arith.constant 0 : i32
    %c0_i32_0 = arith.constant 0 : i32
    %c0_i32_1 = arith.constant 0 : i32
    return %c0_i32, %c0_i32_0 : i32, i32
  }
  func.func @transform_10(%arg0: i32, %arg1: i32) -> (i32, i32) {
    %c0_i32 = arith.constant 0 : i32
    %c0_i32_0 = arith.constant 0 : i32
    %c0_i32_1 = arith.constant 0 : i32
    return %c0_i32, %c0_i32_0 : i32, i32
  }
  func.func @transform_11(%arg0: i32, %arg1: i32) -> (i32, i32) {
    %c0_i32 = arith.constant 0 : i32
    %c0_i32_0 = arith.constant 0 : i32
    %c0_i32_1 = arith.constant 0 : i32
    return %c0_i32, %c0_i32_0 : i32, i32
  }
  func.func @transform_12(%arg0: i32, %arg1: i32) -> (i32, i32) {
    %c0_i32 = arith.constant 0 : i32
    %c0_i32_0 = arith.constant 0 : i32
    %c0_i32_1 = arith.constant 0 : i32
    return %c0_i32, %c0_i32_0 : i32, i32
  }
  func.func @transform_13(%arg0: i32, %arg1: i32) -> (i32, i32) {
    %c0_i32 = arith.constant 0 : i32
    %c0_i32_0 = arith.constant 0 : i32
    %c0_i32_1 = arith.constant 0 : i32
    return %c0_i32, %c0_i32_0 : i32, i32
  }
  func.func @transform_14(%arg0: i32, %arg1: i32) -> (i32, i32, i32) {
    %c0_i32 = arith.constant 0 : i32
    %c0_i32_0 = arith.constant 0 : i32
    return %arg0, %arg1, %c0_i32 : i32, i32, i32
  }
}

</mosaic_0001>

<bundles_post_ra>
// kernel: tpu_custom_call.1
= control target key start
LH: loop header
LB: loop body
LE: loop exit
PB: predicated region body
PF: predicated region fallthrough
CT: control target
= control target key end

     0   :  { %s3508_s0 = inlined_call_operand.hbm [shape: f32[2,8,32], index: 0, kind: input, shape index: {}]   ;;  %s3509_s1 = inlined_call_operand.vmem [shape: f32[2,1,8], index: 1, kind: input, shape index: {}]   ;;  %s3510_s2 = inlined_call_operand.vmem [shape: f32[32,96], index: 2, kind: input, shape index: {}]   ;;  %s3511_s3 = inlined_call_operand.vmem [shape: f32[32,32], index: 3, kind: input, shape index: {}]   ;;  %s3512_s4 = inlined_call_operand.vmem [shape: f32[1,32], index: 4, kind: input, shape index: {}]   ;;  %s3513_s5 = inlined_call_operand.vmem [shape: f32[1,32], index: 5, kind: input, shape index: {}]   ;;  %s3514_s6 = inlined_call_operand.vmem [shape: f32[1,32], index: 6, kind: input, shape index: {}]   ;;  %s3515_s7 = inlined_call_operand.hbm [shape: f32[1,32], index: 7, kind: input, shape index: {}]   ;;  %s3516_s8 = inlined_call_operand.vmem [shape: f32[32,64], index: 8, kind: input, shape index: {}]   ;;  %s3517_s9 = inlined_call_operand.hbm [shape: f32[1,64], index: 9, kind: input, shape index: {}]   ;;  %s3518_s10 = inlined_call_operand.vmem [shape: f32[64,32], index: 10, kind: input, shape index: {}]   ;;  %s3519_s11 = inlined_call_operand.vmem [shape: f32[1,32], index: 11, kind: input, shape index: {}]   ;;  %s3520_s12 = inlined_call_operand.vmem [shape: f32[1,32], index: 12, kind: input, shape index: {}]   ;;  %s3521_s13 = inlined_call_operand.vmem [shape: f32[1,32], index: 13, kind: input, shape index: {}]   ;;  %s3522_s14 = inlined_call_operand.hbm [shape: f32[2,8,32], index: 14, kind: output, shape index: {}]  }
   0x1   :  { %3530 = sst [smem:[#allocation17_spill]] %s3514_s6 }
   0x2   :  { %3531 = sst [smem:[#allocation18_spill]] %s3515_s7 }
   0x3   :  { %3532 = sst [smem:[#allocation19_spill]] %s3519_s11 }
   0x4   :  { %3533 = sst [smem:[#allocation20_spill]] %s3522_s14 }
   0x5   :  { %19 = vsyncpa [#allocation6], 0 }
   0x6   :  { %21 = vsyncpa [#allocation6 + $0x1], 0 }
   0x7   :  { %22 = vsyncpa [#allocation9], 0 }
   0x8   :  { %23 = vsyncpa [#allocation7], 0 }
   0x9   :  { %25 = vsyncpa [#allocation7 + $0x1], 0  ;;  %s2966_s29 = smov 0   ;;  %s2968_s30 = smov 0  }
   0xa   :  { %s2970_s15 = smov 0   ;;  %s2972_s16 = smov 0  }
   0xb   :  { %s2974_s12 = smov 0   ;;  %s2976_s17 = smov 0  }
   0xc LB: > { %3534 = sst [smem:[#allocation15_spill]] %s2851_s29  ;;  %s2369_s13 = sadd.s32 4294967295, %s2871_s17   ;;  %s2871_s17 = sphi %s2976_s17, %s31_s17   ;;  %s2867_s12 = sphi %s2974_s12, %s3561_s12   ;;  %s2863_s16 = sphi %s2972_s16, %s3560_s16   ;;  %s2859_s15 = sphi %s2970_s15, %s3559_s15   ;;  %s2855_s30 = sphi %s2968_s30, %s3558_s30   ;;  %s2851_s29 = sphi %s2966_s29, %s3557_s29  }
   0xd   : > { %s2370_s18 = sadd.s32 4294967294, %s2871_s17   ;;  %p63_p0 = scmp.ne.s32.totalorder %s2855_s30, %s2851_s29 }
   0xe   : > { %p3000_p1 = scmp.eq.s32.totalorder %s2369_s13, 0  ;;  %p3004_p2 = scmp.eq.s32.totalorder %s2369_s13, 1 }
   0xf   : > { %p373_p3 = scmp.eq.s32.totalorder %s2370_s18, 1  ;;  %p2371_p5 = scmp.ge.s32.totalorder %s2871_s17, 1 }
  0x10   : > { %s3535_s19 = scalar_select %p3000_p1, 1, 0 }
  0x11   : > { %s3536_s20 = scalar_select %p3004_p2, 1, 0 }
  0x12   : > { %p3010_p4 = por %p3000_p1, %p63_p0  ;;  %p3015_p6 = por %p373_p3, %p63_p0 }
  0x13   : > { %p380_p7 = scmp.lt.s32.totalorder %s2871_s17, 3  ;;  %s2873_s24 = smov [#allocation8]  }
  0x14   : > { %s3537_s21 = scalar_select %p3010_p4, 1, 0 }
  0x15   : > { %s3538_s22 = scalar_select %p3015_p6, 1, 0 }
  0x16   : > { %p3020_p8 = pnand %p2371_p5, %p380_p7  ;;  %s408_s25 = sshll.u32 %s2873_s24, 4  ;;  %s409_s25 = int_to_ptr.vmem [resolvable:$true] %s408_s25 }
  0x17   : > { %3539 = sst [smem:[#allocation16_spill]] %s3538_s22  ;;  %s2874_s26 = smov [#allocation10]  }
  0x18   : > { %s3540_s23 = scalar_select %p3020_p8, 1, 0 }
  0x19   : > { %p2590_p10 = pneg %p3020_p8  ;;  %s422_s27 = sshll.u32 %s2874_s26, 4  ;;  %s3033_s27 = int_to_ptr.vmem [resolvable:$true] %s422_s27 }
  0x1a   : > { %s3542_s7 = sld [smem:[#allocation18_spill]] }
  0x1b   : > { %p3029_p11 = pnand %p2590_p10, %p3000_p1 }
  0x1d   : > { %p2701_p13 = pneg %p3029_p11 }
  0x20   : > { %s2699_s22 = scalar_lea.hbm %s3542_s7, 16 }
  0x21   : > { %p2700_p12 = scmp.ne.s32.totalorder %s3542_s7, %s2699_s22  ;;  %p2706_p5 = scmp.lt.u32.totalorder %s2699_s22, %s3542_s7 }
  0x23   : > { %p2702_p0 = pnand %p2701_p13, %p2700_p12 }
  0x25   : > { %p2703_p3 = pneg %p2702_p0 }
  0x27   : > { %p2708_p7 = pnand %p2706_p5, %p2703_p3 }
  0x29   : > { %2711 = shalt.err (!%p2708_p7)
}
  0x2a   : > { %s2712_s11 = scalar_lea.vmem %s409_s25, 16  ;;  %s2719_s29 = scalar_lea.vmem %s409_s25, 32 }
  0x2b   : > { %p2713_p10 = scmp.ne.s32.totalorder %s409_s25, %s2712_s11  ;;  %p2720_p1 = scmp.lt.s32.totalorder %s409_s25, %s409_s25 }
  0x2c   : > { %p2721_p4 = scmp.lt.s32.totalorder %s2719_s29, %s2712_s11 }
  0x2d   : > { %p2715_p9 = pnand %p2713_p10, %p2701_p13 }
  0x2e   : > { %p2722_p8 = por %p2721_p4, %p2720_p1 }
  0x2f   : > { %p2716_p6 = pneg %p2715_p9 }
  0x31   : > { %p2723_p2 = pnand %p2722_p8, %p2716_p6 }
  0x33   : > { %2726 = shalt.err (!%p2723_p2)
}
  0x34   : > { %2593 = dma.hbm_to_vmem [thread:$0]  (!%p3029_p11), %s3542_s7, 16, %s409_s25, [#allocation9]  }
  0x35   : > { %s2727_s24 = scalar_lea.hbm %s3517_s9, 16 }
  0x36   : > { %p2728_p9 = scmp.ne.s32.totalorder %s3517_s9, %s2727_s24  ;;  %p2734_p2 = scmp.lt.u32.totalorder %s2727_s24, %s3517_s9 }
  0x38   : > { %p2730_p1 = pnand %p2728_p9, %p2701_p13 }
  0x3a   : > { %p2731_p4 = pneg %p2730_p1 }
  0x3c   : > { %p2736_p6 = pnand %p2734_p2, %p2731_p4 }
  0x3e   : > { %2739 = shalt.err (!%p2736_p6)
}
  0x3f   : > { %s2740_s25 = scalar_lea.vmem %s3033_s27, 16  ;;  %s2747_s6 = scalar_lea.vmem %s3033_s27, 32 }
  0x40   : > { %p2741_p8 = scmp.ne.s32.totalorder %s3033_s27, %s2740_s25  ;;  %p2748_p3 = scmp.lt.s32.totalorder %s3033_s27, %s3033_s27 }
  0x41   : > { %p2749_p5 = scmp.lt.s32.totalorder %s2747_s6, %s2740_s25 }
  0x42   : > { %p2743_p12 = pnand %p2741_p8, %p2701_p13 }
  0x43   : > { %p2750_p7 = por %p2749_p5, %p2748_p3 }
  0x44   : > { %p2744_p0 = pneg %p2743_p12 }
  0x46   : > { %p2751_p10 = pnand %p2750_p7, %p2744_p0 }
  0x48   : > { %2754 = shalt.err (!%p2751_p10)
}
  0x49   : > { %2596 = dma.hbm_to_vmem [thread:$0]  (!%p3029_p11), %s3517_s9, 16, %s3033_s27, [#allocation9]  }
  0x4a   : > { %s43_s22 = sadd.s32 1, %s2867_s12  ;;  %s50_s18 = sadd.s32 1, %s2859_s15 }
  0x4b   : > { %p45_p13 = scmp.ge.s32.totalorder %s43_s22, 2  ;;  %p57_p9 = scmp.ne.s32.totalorder %s2859_s15, %s2855_s30 }
  0x4c   : > { %p58_p1 = scmp.eq.s32.totalorder %s2871_s17, 0  ;;  %p2607_p4 = scmp.lt.s32.totalorder %s2871_s17, 2 }
  0x4d   : > { %s3563_s22 = smov (%p45_p13, %s43_s22), 0  ;;  %p3543_p6 = scmp.ne.s32.totalorder %s3536_s20, 0 }
  0x4e   : > { %p59_p2 = por %p58_p1, %p57_p9  ;;  %s47_s24 = ssub.s32 %s2867_s12, %s3563_s22 }
  0x4f   : > { %p3093_p8 = por %p3543_p6, %p57_p9  ;;  %s445_s26 = sand.u32 1, %s2859_s15  }
  0x50   : > { %p48_p12 = scmp.eq.s32.totalorder %s47_s24, 0  ;;  %s2375_s27 = sshll.u32 %s445_s26, 3 }
  0x51   : > { %s2376_s11 = sshll.u32 %s2867_s12, 7  ;;  %s449_s20 = scalar_lea.vmem [#allocation5], %s2375_s27 }
  0x52   : > { %s3102_s29 = scalar_select %p48_p12, %s2859_s15, %s50_s18  }
  0x53   : > { %s3107_s13 = scalar_lea.hbm %s3508_s0, %s2376_s11  ;;  %s456_s14 = sshll.u32 %s449_s20, 4  ;;  %s3115_s14 = int_to_ptr.vmem [resolvable:$true] %s456_s14 }
  0x54   : > { %p3111_p11 = pnand %p2607_p4, %p59_p2  ;;  %s446_s18 = scalar_lea.sflag [#allocation6], %s445_s26 }
  0x55   : > { %s2755_s24 = scalar_lea.hbm %s3107_s13, 128  ;;  %s2760_s25 = scalar_lea.hbm %s3508_s0, 256 }
  0x56   : > { %p2756_p0 = scmp.ne.s32.totalorder %s3107_s13, %s2755_s24  ;;  %p2757_p3 = pneg %p3111_p11 }
  0x57   : > { %p2761_p10 = scmp.lt.u32.totalorder %s3107_s13, %s3508_s0  ;;  %p2762_p13 = scmp.lt.u32.totalorder %s2760_s25, %s2755_s24 }
  0x58   : > { %p2758_p5 = pnand %p2757_p3, %p2756_p0  ;;  %p2764_p1 = scmp.lt.u32.totalorder %s2755_s24, %s3107_s13 }
  0x59   : > { %p2763_p9 = por %p2762_p13, %p2761_p10 }
  0x5a   : > { %p2759_p7 = pneg %p2758_p5 }
  0x5b   : > { %p2765_p4 = por %p2764_p1, %p2763_p9 }
  0x5d   : > { %p2766_p2 = pnand %p2765_p4, %p2759_p7 }
  0x5f   : > { %2769 = shalt.err (!%p2766_p2)
}
  0x60   : > { %s2770_s26 = scalar_lea.vmem %s3115_s14, 128  ;;  %s2875_s27 = smov [#allocation5]  }
  0x61   : > { %p2771_p6 = scmp.ne.s32.totalorder %s3115_s14, %s2770_s26  ;;  %s2775_s11 = sshll.u32 %s2875_s27, 4  ;;  %s2776_s11 = int_to_ptr.vmem [resolvable:$false] %s2775_s11 }
  0x62   : > { %s2777_s6 = scalar_lea.vmem %s2776_s11, 256  ;;  %p2778_p5 = scmp.lt.s32.totalorder %s3115_s14, %s2776_s11 }
  0x63   : > { %p2773_p12 = pnand %p2771_p6, %p2757_p3  ;;  %p2779_p10 = scmp.lt.s32.totalorder %s2777_s6, %s2770_s26 }
  0x65   : > { %p2774_p0 = pneg %p2773_p12  ;;  %p2780_p13 = por %p2779_p10, %p2778_p5 }
  0x67   : > { %p2781_p9 = pnand %p2780_p13, %p2774_p0 }
  0x69   : > { %2784 = shalt.err (!%p2781_p9)
}
  0x6a   : > { %2600 = dma.hbm_to_vmem [thread:$0]  (!%p3111_p11), %s3107_s13, 128, %s3115_s14, %s446_s18  }
  0x6b   : > { %p3546_p7 = scmp.ne.s32.totalorder %s3540_s23, 0 }
  0x6c   : > { %s3145_s24 = sand.u32 (!%p3546_p7), 1, %s2855_s30   ;;  %p3547_p3 = scmp.ne.s32.totalorder (!%p3546_p7), %s3537_s21, 0 }
  0x6d   : > { %471 = sbr.rel (%p3546_p7) target bundleno = 2832 (0xb10), region = 76  ;;  %s2378_s25 = sshll.u32 (!%p3546_p7), %s3145_s24, 3 }
  0x6e   : > { %s474_s20 = scalar_lea.sflag (!%p3546_p7), [#allocation6], %s3145_s24  ;;  %s477_s26 = scalar_lea.vmem (!%p3546_p7), [#allocation5], %s2378_s25 }
  0x74   : > { %2838 = dma.done.wait (%p3547_p3), %s474_s20, 128  }
  0x75   : > { %2840 = vsyncadd (%p3547_p3), %s474_s20, 4294967168  ;;  %p3548_p11 = scmp.ne.s32.totalorder %s3535_s19, 0 }
  0x77   : > { %2842 = dma.done.wait (%p3548_p11), [#allocation9], 32  }
  0x78   : > { %2844 = vsyncadd (%p3548_p11), [#allocation9], 4294967264  ;;  %vm543_vm0 = vcmask 261120   ;;  %v3159_v0 = vld [vmem:[%s477_s26] sm:$0xff]  ;;  %v584_v9 = vld [vmem:[%s3510_s2 + $0x10] sm:$0xff]  ;;  %v2876_v10 = vmov 0.0|0.0   ;;  %v674_v36 = vlaneseq }
  0x79   : > { %v544_v1 = vsel %vm543_vm0, %v3159_v0, 0.0  ;;  %v582_v7 = vld [vmem:[%s3510_s2] sm:$0xff]  ;;  %v583_v8 = vld [vmem:[%s3510_s2 + $0x8] sm:$0xff]  ;;  %2548 = vmatprep.subr.bf16.mxu1 %v2876_v10  ;;  %v585_v12 = vld [vmem:[%s3510_s2 + $0x18] sm:$0xff]  ;;  %vm2877_vm1 = vmmov 0   ;;  %v2878_v13 = vmov 0.0  }
  0x7a   : > { %545 = vadd.xlane.f32.xlu0 %v544_v1  ;;  %v2549_v11 = vpack.c.bf16 %v583_v8, %v582_v7  ;;  %2464 = vmatprep.mubr.msk.f32.mxu1 %vm2877_vm1, %v2878_v13  ;;  %v2552_v14 = vpack.c.bf16 %v585_v12, %v584_v9  ;;  %v2382_v25 = vld [vmem:[%s3512_s4] ss:$0 sm:$0xff]  ;;  %s2879_s7 = smov 104   ;;  %s2880_s21 = smov 120   ;;  %v2883_v34 = vmov 1983009808  }
  0x7b   : > { %2477 = vmatprep.subr.mxu0 %v2878_v13  ;;  %2479 = vmatprep.mubr.msk.f32.mxu0 %vm2877_vm1, %v2878_v13  ;;  %v2383_v29 = vld [vmem:[%s3513_s5] ss:$0 sm:$0xff]  ;;  %s2881_s19 = smov 112   ;;  %s2882_s23 = smov 96   ;;  %v672_v35 = vunpack.c.l.s4 %v2883_v34  ;;  %v2884_v37 = vmov 1934713408  }
  0x7c   : > { %2550 = vmatpush3.bf16.msra.mxu1 %v2549_v11  ;;  %v704_v38 = vunpack.c.l.s4 %v2884_v37  ;;  %v3200_v40 = vshrl.u32 %v674_v36, 7  ;;  %vm805_vm4 = vcmask 64512   ;;  %p533_p1 = scmp.lt.s32.totalorder %s2863_s16, 1  ;;  %s2886_s11 = smov 64   ;;  %vm1944_vm7 = vcmask 130048  }
  0x7d   : > { %2551 = vmatprep.subr.bf16.mxu1 %v2876_v10  ;;  %v673_v39 = vunpack.c.0.s8 %v672_v35  ;;  %s2887_s14 = smov 16   ;;  %s2888_s18 = smov 8   ;;  %vm1946_vm8 = vcmask 195584   ;;  %vm2167_vm11 = vcmask 523264  }
  0x7e   : > { %v705_v43 = vunpack.c.0.s8 %v704_v38  ;;  %s534_s13 = scalar_select %p533_p1, %s2863_s16, 1 }
  0x7f   : > { %v3208_v44 = vsub.s32 %v673_v39, %v3200_v40 }
  0x80   : > { %2553 = vmatpush3.bf16.msra.mxu1 %v2552_v14  ;;  %v3222_v50 = vsub.s32 %v705_v43, %v3200_v40  ;;  %s535_s27 = scalar_lea.vmem %s3509_s1, %s534_s13 }
  0x81   : > { %2467 = vmatprep.subr.mxu1 %v2878_v13 }
 0x107   : > { %v546_v2 = vpop.xlane.xlu0 %545 }
 0x108   : > { %v548_v3 = vmul.f32 0.03125, %v546_v2 }
 0x10a   : > { %v549_v4 = vsub.f32 %v3159_v0, %v548_v3 }
 0x10c   : > { %v550_v5 = vmul.f32 %v549_v4, %v549_v4  ;;  %v568_v27 = vmul.f32 %v2382_v25, %v549_v4 }
 0x10e   : > { %v551_v6 = vsel %vm543_vm0, %v550_v5, 0.0 }
 0x10f   : > { %552 = vadd.xlane.f32.xlu0 %v551_v6 }
 0x19c   : > { %v553_v15 = vpop.xlane.xlu0 %552 }
 0x19d   : > { %v554_v16 = vmul.f32 0.032258064, %v553_v15 }
 0x19f   : > { %2675 = vrsqrt.f32 %v554_v16  ;;  %vm557_vm2 = vcmp.eq.f32.partialorder %v554_v16, inf  ;;  %v560_v19 = vand.u32 2147483648, %v554_v16  ;;  %vm559_vm3 = vcmp.eq.f32.partialorder %v554_v16, 0.0 }
 0x1a9   : > { %v2676_v17 = vpop.eup %2675 }
 0x1aa   : > { %v556_v18 = vmul.f32 %v2676_v17, %v554_v16 }
 0x1ac   : > { %v558_v20 = vsel %vm557_vm2, %v554_v16, %v556_v18 }
 0x1ad   : > { %v561_v21 = vsel %vm559_vm3, %v560_v19, %v558_v20 }
 0x1ae   : > { %v569_v22 = vadd.f32 1e-06, %v561_v21 }
 0x1b0   : > { %2677 = vrcp.f32 %v569_v22 }
 0x1ba   : > { %v2678_v23 = vpop.eup %2677 }
 0x1bb   : > { %v571_v24 = vmul.f32 %v2678_v23, %v569_v22 }
 0x1bd   : > { %v572_v26 = vsub.f32 2.0, %v571_v24 }
 0x1bf   : > { %v573_v28 = vmul.f32 %v2678_v23, %v572_v26 }
 0x1c1   : > { %v574_v30 = vmul.f32 %v573_v28, %v568_v27 }
 0x1c3   : > { %v581_v31 = vadd.f32 %v2383_v29, %v574_v30 }
 0x1c5   : > { %2465 = vmatmul.mubr.msk.f32.vlgmr.msra.gmra.mrb[0].mxu1 %vm543_vm0, %v581_v31 }
 0x1c6   : > { %2469 = vmatprep.mubr.msk.f32.mxu1 %vm2877_vm1, %v2878_v13 }
 0x298   : > { %v3194_v32 = vpop.f32.mrb[0].mxu1 }
 0x299   : > { %666 = vrot.lane.b32.xlu0 %v3194_v32, %s2879_s7  ;;  %660 = vrot.lane.b32.xlu1 %v3194_v32, %s2880_s21  ;;  %v2466_v33 = vpop.f32.mrb[1].mxu1  ;;  %s3550_s21 = sld [smem:[#allocation19_spill]] }
 0x29d   : > { %663 = vrot.lane.b32.xlu1 %v3194_v32, %s2881_s19  ;;  %s2413_s19 = sshll.u32 %s2863_s16, 7  ;;  %s2244_s16 = scalar_lea.sflag [#allocation7], %s3145_s24 }
 0x2a1   : > { %810 = vrot.lane.b32.xlu1 %v3194_v32, %s2882_s23 }
 0x30b   : > { %v3202_v41 = vpop.permute.xlu0 %666  ;;  %v3204_v42 = vpop.permute.xlu1 %660 }
 0x30c   : > { %812 = vrot.lane.b32.xlu1 %v3204_v42, %s2882_s23  ;;  %v685_v45 = vcombine.low %v3204_v42, %v3202_v41  ;;  %v686_v46 = vcombine.high %v3204_v42, %v3202_v41 }
 0x30e   : > { %v693_v51 = vrot.slane %v685_v45, %v3208_v44  ;;  %v700_v52 = vrot.slane %v686_v46, %v3208_v44 }
 0x30f   : > { %v3214_v47 = vpop.permute.xlu1 %663 }
 0x310   : > { %v669_v48 = vcombine.low %v3194_v32, %v3214_v47  ;;  %v670_v49 = vcombine.high %v3194_v32, %v3214_v47  ;;  %814 = vrot.lane.b32.xlu1 %v3214_v47, %s2882_s23 }
 0x312   : > { %v677_v53 = vrot.slane %v669_v48, %v3208_v44  ;;  %v684_v54 = vrot.slane %v670_v49, %v3208_v44 }
 0x313   : > { %v811_v22 = vpop.permute.xlu1 %810 }
 0x314   : > { %v701_v55 = vcombine.low %v677_v53, %v693_v51  ;;  %v702_v56 = vcombine.high %v677_v53, %v693_v51  ;;  %v717_v57 = vcombine.low %v684_v54, %v700_v52  ;;  %v718_v58 = vcombine.high %v684_v54, %v700_v52  ;;  %816 = vrot.lane.b32.xlu1 %v3202_v41, %s2882_s23  ;;  %s532_s23 = scalar_lea.vmem [#allocation11], %s2378_s25  ;;  %s2890_s25 = smov [#allocation11]  }
 0x315   : > { %s2258_s13 = sshll.u32 %s532_s23, 4  ;;  %s2789_s20 = sshll.u32 %s2890_s25, 4  ;;  %s3460_s13 = int_to_ptr.vmem [resolvable:$true] %s2258_s13  ;;  %s2790_s20 = int_to_ptr.vmem [resolvable:$false] %s2789_s20 }
 0x316   : > { %v709_v59 = vrot.slane %v701_v55, %v3222_v50  ;;  %v716_v60 = vrot.slane %v702_v56, %v3222_v50  ;;  %v725_v61 = vrot.slane %v717_v57, %v3222_v50  ;;  %v732_v62 = vrot.slane %v718_v58, %v3222_v50  ;;  %s2785_s6 = scalar_lea.vmem %s3460_s13, 128  ;;  %s2791_s26 = scalar_lea.vmem %s2790_s20, 256 }
 0x317   : > { %p2786_p4 = scmp.ne.s32.totalorder %s3460_s13, %s2785_s6  ;;  %p2792_p12 = scmp.lt.s32.totalorder %s3460_s13, %s2790_s20 }
 0x318   : > { %v737_v63 = vcombine.low %v709_v59, %v716_v60  ;;  %v2385_v1 = vcombine.high %v709_v59, %v716_v60  ;;  %v753_v2 = vcombine.low %v725_v61, %v732_v62  ;;  %v2386_v3 = vcombine.high %v725_v61, %v732_v62  ;;  %p2793_p0 = scmp.lt.s32.totalorder %s2791_s26, %s2785_s6 }
 0x319   : > { %p2787_p2 = pnand %p2786_p4, %p3093_p8 }
 0x31a   : > { %v744_v4 = vrot.slane %v737_v63, %v3208_v44  ;;  %v752_v5 = vrot.slane %v2385_v1, %v3208_v44  ;;  %v760_v6 = vrot.slane %v753_v2, %v3208_v44  ;;  %v768_v7 = vrot.slane %v2386_v3, %v3208_v44  ;;  %p2794_p5 = por %p2793_p0, %p2792_p12 }
 0x31b   : > { %p2788_p6 = pneg %p2787_p2 }
 0x31c   : > { %v769_v8 = vcombine.low %v744_v4, %v752_v5  ;;  %v770_v9 = vcombine.high %v744_v4, %v752_v5  ;;  %v785_v11 = vcombine.low %v760_v6, %v768_v7  ;;  %v786_v12 = vcombine.high %v760_v6, %v768_v7 }
 0x31d   : > { %p2795_p10 = pnand %p2794_p5, %p2788_p6 }
 0x31e   : > { %v777_v14 = vrot.slane %v769_v8, %v3222_v50  ;;  %v784_v15 = vrot.slane %v770_v9, %v3222_v50  ;;  %v793_v16 = vrot.slane %v785_v11, %v3222_v50  ;;  %v800_v17 = vrot.slane %v786_v12, %v3222_v50 }
 0x320   : > { %v801_v18 = vcombine.low %v777_v14, %v793_v16  ;;  %v802_v19 = vcombine.high %v777_v14, %v793_v16  ;;  %v803_v20 = vcombine.low %v784_v15, %v800_v17  ;;  %v804_v21 = vcombine.high %v784_v15, %v800_v17  ;;  %v1117_v16 = vld [vmem:[%s535_s27] sm:$0x1]  ;;  %s2889_s27 = smov 24  }
 0x321   : > { %vm1118_vm5 = vcmp.eq.f32.partialorder %v1117_v16, 0.0  ;;  %v1440_v17 = vsub.s32 0, %v3200_v40 }
 0x322   : > { %806 = vst.msk [vmem:[#allocation2] sm:$0xff] %vm805_vm4, %v801_v18  ;;  %807 = vst.msk [vmem:[#allocation2 + $0x8] sm:$0xff] %vm805_vm4, %v802_v19  ;;  %v2885_v18 = vmov 0  }
 0x323   : > { %808 = vst.msk [vmem:[#allocation2 + $0x10] sm:$0xff] %vm805_vm4, %v803_v20  ;;  %809 = vst.msk [vmem:[#allocation2 + $0x18] sm:$0xff] %vm805_vm4, %v804_v21  ;;  %v1437_v19 = vsel %vm1118_vm5, 1, %v2885_v18 }
 0x324   : > { %v1441_v20 = vrot.slane %v1437_v19, %v1440_v17 }
 0x326   : > { %vm1442_vm6 = vcmp.eq.s32.totalorder %v1441_v20, 1 }
 0x329   : > { %v1120_v8 = vld [vmem:[#allocation2] sm:$0xff]  ;;  %v1121_v12 = vld [vmem:[#allocation2 + $0x8] sm:$0xff] }
 0x32a   : > { %v1122_v9 = vld [vmem:[#allocation2 + $0x10] sm:$0xff]  ;;  %v1123_v15 = vld [vmem:[#allocation2 + $0x18] sm:$0xff] }
 0x37e   : > { %v813_v23 = vpop.permute.xlu1 %812 }
 0x382   : > { %v815_v24 = vpop.permute.xlu1 %814 }
 0x383   : > { %v822_v25 = vcombine.low %v811_v22, %v815_v24  ;;  %v823_v26 = vcombine.high %v811_v22, %v815_v24 }
 0x385   : > { %v830_v30 = vrot.slane %v822_v25, %v3208_v44  ;;  %v837_v31 = vrot.slane %v823_v26, %v3208_v44 }
 0x386   : > { %v817_v27 = vpop.permute.xlu1 %816 }
 0x387   : > { %v838_v28 = vcombine.low %v813_v23, %v817_v27  ;;  %v839_v29 = vcombine.high %v813_v23, %v817_v27 }
 0x389   : > { %v846_v33 = vrot.slane %v838_v28, %v3208_v44  ;;  %v853_v34 = vrot.slane %v839_v29, %v3208_v44 }
 0x38b   : > { %v854_v35 = vcombine.low %v830_v30, %v846_v33  ;;  %v855_v36 = vcombine.high %v830_v30, %v846_v33  ;;  %v870_v37 = vcombine.low %v837_v31, %v853_v34  ;;  %v871_v38 = vcombine.high %v837_v31, %v853_v34 }
 0x38d   : > { %v862_v39 = vrot.slane %v854_v35, %v3222_v50  ;;  %v869_v43 = vrot.slane %v855_v36, %v3222_v50  ;;  %v878_v45 = vrot.slane %v870_v37, %v3222_v50  ;;  %v885_v46 = vrot.slane %v871_v38, %v3222_v50 }
 0x38f   : > { %v890_v48 = vcombine.low %v862_v39, %v869_v43  ;;  %v2387_v49 = vcombine.high %v862_v39, %v869_v43  ;;  %v906_v51 = vcombine.low %v878_v45, %v885_v46  ;;  %v2388_v52 = vcombine.high %v878_v45, %v885_v46 }
 0x391   : > { %v897_v53 = vrot.slane %v890_v48, %v3208_v44  ;;  %v905_v54 = vrot.slane %v2387_v49, %v3208_v44  ;;  %v913_v55 = vrot.slane %v906_v51, %v3208_v44  ;;  %v921_v56 = vrot.slane %v2388_v52, %v3208_v44 }
 0x393   : > { %v922_v57 = vcombine.low %v897_v53, %v905_v54  ;;  %v923_v58 = vcombine.high %v897_v53, %v905_v54  ;;  %v938_v59 = vcombine.low %v913_v55, %v921_v56  ;;  %v939_v60 = vcombine.high %v913_v55, %v921_v56 }
 0x395   : > { %v930_v61 = vrot.slane %v922_v57, %v3222_v50  ;;  %v937_v62 = vrot.slane %v923_v58, %v3222_v50  ;;  %v946_v63 = vrot.slane %v938_v59, %v3222_v50  ;;  %v953_v1 = vrot.slane %v939_v60, %v3222_v50 }
 0x397   : > { %v954_v2 = vcombine.low %v930_v61, %v946_v63  ;;  %v955_v3 = vcombine.high %v930_v61, %v946_v63  ;;  %v956_v4 = vcombine.low %v937_v62, %v953_v1  ;;  %v957_v5 = vcombine.high %v937_v62, %v953_v1 }
 0x399   : > { %958 = vst.msk [vmem:[#allocation3] sm:$0xff] %vm805_vm4, %v954_v2  ;;  %959 = vst.msk [vmem:[#allocation3 + $0x8] sm:$0xff] %vm805_vm4, %v955_v3 }
 0x39a   : > { %960 = vst.msk [vmem:[#allocation3 + $0x10] sm:$0xff] %vm805_vm4, %v956_v4  ;;  %961 = vst.msk [vmem:[#allocation3 + $0x18] sm:$0xff] %vm805_vm4, %v957_v5 }
 0x3a0   : > { %v1124_v6 = vld [vmem:[#allocation3] sm:$0xff]  ;;  %v1125_v11 = vld [vmem:[#allocation3 + $0x8] sm:$0xff] }
 0x3a1   : > { %v1126_v7 = vld [vmem:[#allocation3 + $0x10] sm:$0xff]  ;;  %2468 = vmatpush3.xpose.msk.msra.mxu1 %vm805_vm4, %v1124_v6  ;;  %v1127_v14 = vld [vmem:[#allocation3 + $0x18] sm:$0xff] }
 0x3a2   : > { %2478 = vmatpush3.xpose.msk.msra.mxu0 %vm805_vm4, %v1126_v7  ;;  %2472 = vmatprep.subr.mxu1 %v2878_v13 }
 0x3a3   : > { %2487 = vmatprep.subr.mxu0 %v2878_v13 }
 0x3a4   : > { %2470 = vmatmul.mubr.msk.f32.vlgmr.msra.gmra.mrb[2].mxu1 %vm805_vm4, %v1120_v8 }
 0x3a5   : > { %2480 = vmatmul.mubr.msk.f32.vlgmr.msra.gmra.mrb[0].mxu0 %vm805_vm4, %v1122_v9  ;;  %2473 = vmatpush3.xpose.msk.msra.mxu1 %vm805_vm4, %v1125_v11 }
 0x3a6   : > { %2474 = vmatprep.mubr.msk.f32.mxu1 %vm2877_vm1, %v2878_v13  ;;  %2482 = vmatprep.subr.mxu1 %v2878_v13 }
 0x3a7   : > { %2489 = vmatprep.mubr.msk.f32.mxu0 %vm2877_vm1, %v2878_v13 }
 0x3a8   : > { %2475 = vmatmul.mubr.msk.f32.vlgmr.msra.gmra.mrb[4].mxu1 %vm805_vm4, %v1121_v12 }
 0x3a9   : > { %2483 = vmatpush3.xpose.msk.msra.mxu1 %vm805_vm4, %v1127_v14  ;;  %2484 = vmatprep.mubr.msk.f32.mxu1 %vm2877_vm1, %v2878_v13 }
 0x3aa   : > { %2492 = vmatprep.subr.mxu1 %v2878_v13 }
 0x3ac   : > { %2485 = vmatmul.mubr.msk.f32.vlgmr.msra.gmra.mrb[6].mxu1 %vm805_vm4, %v1123_v15 }
 0x3ad   : > { %2494 = vmatprep.mubr.msk.f32.mxu1 %vm2877_vm1, %v2878_v13 }
 0x477   : > { %v1205_v21 = vpop.f32.mrb[2].mxu1 }
 0x478   : > { %v1357_v22 = vpop.f32.mrb[0].mxu0  ;;  %v1443_v23 = vsel %vm1442_vm6, -2e+09, %v1205_v21  ;;  %v2471_v24 = vpop.f32.mrb[3].mxu1 }
 0x479   : > { %v2481_v25 = vpop.f32.mrb[1].mxu0  ;;  %v1447_v26 = vsel %vm805_vm4, %v1443_v23, -inf  ;;  %v1445_v27 = vsel %vm1442_vm6, -2e+09, %v1357_v22 }
 0x47a   : > { %1448 = vmax.xlane.f32.xlu1 %v1447_v26  ;;  %v1453_v40 = vsel %vm805_vm4, %v1445_v27, -inf }
 0x47b   : > { %v1281_v28 = vpop.f32.mrb[4].mxu1 }
 0x47c   : > { %v1444_v29 = vsel %vm1442_vm6, -2e+09, %v1281_v28  ;;  %v2476_v30 = vpop.f32.mrb[5].mxu1 }
 0x47d   : > { %v1450_v31 = vsel %vm805_vm4, %v1444_v29, -inf }
 0x47e   : > { %1454 = vmax.xlane.f32.xlu1 %v1453_v40  ;;  %1451 = vmax.xlane.f32.xlu0 %v1450_v31 }
 0x47f   : > { %v1433_v33 = vpop.f32.mrb[6].mxu1 }
 0x480   : > { %v1446_v34 = vsel %vm1442_vm6, -2e+09, %v1433_v33  ;;  %v2486_v35 = vpop.f32.mrb[7].mxu1 }
 0x481   : > { %v1456_v36 = vsel %vm805_vm4, %v1446_v34, -inf }
 0x482   : > { %1457 = vmax.xlane.f32.xlu0 %v1456_v36 }
 0x48f   : > { %962 = vrot.lane.b32.xlu1 %v3194_v32, %s2886_s11 }
 0x507   : > { %v1449_v37 = vpop.xlane.xlu1 %1448 }
 0x508   : > { %v1459_v38 = vsub.f32 %v1443_v23, %v1449_v37 }
 0x50a   : > { %v1463_v39 = vmul.f32 1.442695, %v1459_v38 }
 0x50b   : > { %v1455_v43 = vpop.xlane.xlu1 %1454  ;;  %v1452_v45 = vpop.xlane.xlu0 %1451 }
 0x50c   : > { %2679 = vpow2.f32 %v1463_v39  ;;  %v1461_v46 = vsub.f32 %v1445_v27, %v1455_v43  ;;  %v1460_v48 = vsub.f32 %v1444_v29, %v1452_v45 }
 0x50e   : > { %v1467_v49 = vmul.f32 1.442695, %v1461_v46  ;;  %v1465_v51 = vmul.f32 1.442695, %v1460_v48 }
 0x50f   : > { %v1458_v52 = vpop.xlane.xlu0 %1457  ;;  %v963_v62 = vpop.permute.xlu1 %962 }
 0x510   : > { %2681 = vpow2.f32 %v1467_v49  ;;  %v1462_v53 = vsub.f32 %v1446_v34, %v1458_v52 }
 0x511   : > { %2683 = vpow2.f32 %v1465_v51 }
 0x512   : > { %v1469_v54 = vmul.f32 1.442695, %v1462_v53 }
 0x514   : > { %2685 = vpow2.f32 %v1469_v54 }
 0x516   : > { %v3301_v55 = vpop.eup %2679 }
 0x517   : > { %v1471_v32 = vsel %vm805_vm4, %v3301_v55, 0.0 }
 0x518   : > { %1472 = vadd.xlane.f32.xlu1 %v1471_v32 }
 0x51a   : > { %v3305_v56 = vpop.eup %2681 }
 0x51b   : > { %v3307_v57 = vpop.eup %2683  ;;  %v1477_v58 = vsel %vm805_vm4, %v3305_v56, 0.0 }
 0x51c   : > { %1478 = vadd.xlane.f32.xlu1 %v1477_v58  ;;  %v1474_v59 = vsel %vm805_vm4, %v3307_v57, 0.0 }
 0x51d   : > { %1475 = vadd.xlane.f32.xlu0 %v1474_v59 }
 0x51e   : > { %v3313_v60 = vpop.eup %2685 }
 0x51f   : > { %v1480_v61 = vsel %vm805_vm4, %v3313_v60, 0.0 }
 0x521   : > { %1481 = vadd.xlane.f32.xlu0 %v1480_v61 }
 0x52d   : > { %966 = vrot.lane.b32.xlu1 %v3214_v47, %s2886_s11 }
 0x531   : > { %968 = vrot.lane.b32.xlu1 %v3202_v41, %s2886_s11 }
 0x537   : > { %964 = vrot.lane.b32.xlu0 %v3204_v42, %s2886_s11 }
 0x5a5   : > { %v1473_v63 = vpop.xlane.xlu1 %1472 }
 0x5a6   : > { %2687 = vrcp.f32 %v1473_v63 }
 0x5a9   : > { %v1479_v1 = vpop.xlane.xlu1 %1478 }
 0x5aa   : > { %v1476_v2 = vpop.xlane.xlu0 %1475 }
 0x5ab   : > { %2689 = vrcp.f32 %v1476_v2 }
 0x5ac   : > { %2691 = vrcp.f32 %v1479_v1 }
 0x5ad   : > { %v967_v3 = vpop.permute.xlu1 %966 }
 0x5ae   : > { %v1482_v4 = vpop.xlane.xlu0 %1481  ;;  %v974_v5 = vcombine.low %v963_v62, %v967_v3  ;;  %v975_v7 = vcombine.high %v963_v62, %v967_v3 }
 0x5af   : > { %2693 = vrcp.f32 %v1482_v4 }
 0x5b0   : > { %v982_v47 = vrot.slane %v974_v5, %v3208_v44  ;;  %v989_v12 = vrot.slane %v975_v7, %v3208_v44  ;;  %v2688_v26 = vpop.eup %2687 }
 0x5b1   : > { %v969_v6 = vpop.permute.xlu1 %968  ;;  %v1487_v37 = vmul.f32 %v2688_v26, %v1473_v63 }
 0x5b2   : > { %v965_v8 = vpop.permute.xlu0 %964 }
 0x5b3   : > { %v990_v9 = vcombine.low %v965_v8, %v969_v6  ;;  %v991_v11 = vcombine.high %v965_v8, %v969_v6  ;;  %v1491_v54 = vsub.f32 2.0, %v1487_v37 }
 0x5b5   : > { %v998_v41 = vrot.slane %v990_v9, %v3208_v44  ;;  %v1005_v42 = vrot.slane %v991_v11, %v3208_v44  ;;  %v2690_v29 = vpop.eup %2689  ;;  %v1495_v61 = vmul.f32 %v2688_v26, %v1491_v54 }
 0x5b6   : > { %v2692_v36 = vpop.eup %2691  ;;  %v1488_v38 = vmul.f32 %v2690_v29, %v1476_v2 }
 0x5b7   : > { %v1006_v14 = vcombine.low %v982_v47, %v998_v41  ;;  %v1007_v15 = vcombine.high %v982_v47, %v998_v41  ;;  %v1022_v16 = vcombine.low %v989_v12, %v1005_v42  ;;  %v1023_v17 = vcombine.high %v989_v12, %v1005_v42 }
 0x5b8   : > { %v1489_v32 = vmul.f32 %v2692_v36, %v1479_v1  ;;  %v1492_v58 = vsub.f32 2.0, %v1488_v38  ;;  %v1499_v3 = vmul.f32 %v3301_v55, %v1495_v61 }
 0x5b9   : > { %v1014_v18 = vrot.slane %v1006_v14, %v3222_v50  ;;  %v1021_v19 = vrot.slane %v1007_v15, %v3222_v50  ;;  %v1030_v20 = vrot.slane %v1022_v16, %v3222_v50  ;;  %v1037_v21 = vrot.slane %v1023_v17, %v3222_v50  ;;  %v2694_v45 = vpop.eup %2693 }
 0x5ba   : > { %v1490_v59 = vmul.f32 %v2694_v45, %v1482_v4  ;;  %v1493_v62 = vsub.f32 2.0, %v1489_v32  ;;  %v1496_v63 = vmul.f32 %v2690_v29, %v1492_v58 }
 0x5bb   : > { %v1042_v22 = vcombine.low %v1014_v18, %v1021_v19  ;;  %v2389_v23 = vcombine.high %v1014_v18, %v1021_v19  ;;  %v1058_v24 = vcombine.low %v1030_v20, %v1037_v21  ;;  %v2390_v25 = vcombine.high %v1030_v20, %v1037_v21 }
 0x5bc   : > { %v1494_v2 = vsub.f32 2.0, %v1490_v59  ;;  %v1497_v5 = vmul.f32 %v2692_v36, %v1493_v62  ;;  %v1500_v6 = vmul.f32 %v3307_v57, %v1496_v63  ;;  %v1949_v57 = vld [vmem:[%s3511_s3 + $0x8] sm:$0xff] }
 0x5bd   : > { %v1049_v27 = vrot.slane %v1042_v22, %v3208_v44  ;;  %v1057_v28 = vrot.slane %v2389_v23, %v3208_v44  ;;  %v1065_v30 = vrot.slane %v1058_v24, %v3208_v44  ;;  %v1073_v40 = vrot.slane %v2390_v25, %v3208_v44 }
 0x5be   : > { %v1498_v1 = vmul.f32 %v2694_v45, %v1494_v2  ;;  %v1501_v55 = vmul.f32 %v3305_v56, %v1497_v5  ;;  %v1948_v56 = vld [vmem:[%s3511_s3] sm:$0xff] }
 0x5bf   : > { %v1074_v31 = vcombine.low %v1049_v27, %v1057_v28  ;;  %v1075_v33 = vcombine.high %v1049_v27, %v1057_v28  ;;  %v1090_v34 = vcombine.low %v1065_v30, %v1073_v40  ;;  %v1091_v35 = vcombine.high %v1065_v30, %v1073_v40  ;;  %v1950_v30 = vld [vmem:[%s3511_s3 + $0x10] sm:$0xff]  ;;  %v1951_v40 = vld [vmem:[%s3511_s3 + $0x18] sm:$0xff] }
 0x5c0   : > { %v1502_v11 = vmul.f32 %v3313_v60, %v1498_v1  ;;  %v2555_v60 = vpack.c.bf16 %v1949_v57, %v1948_v56  ;;  %v2558_v36 = vpack.c.bf16 %v1951_v40, %v1950_v30 }
 0x5c1   : > { %v1082_v39 = vrot.slane %v1074_v31, %v3222_v50  ;;  %v1089_v43 = vrot.slane %v1075_v33, %v3222_v50  ;;  %v1098_v46 = vrot.slane %v1090_v34, %v3222_v50  ;;  %v1105_v48 = vrot.slane %v1091_v35, %v3222_v50 }
 0x5c3   : > { %v1106_v49 = vcombine.low %v1082_v39, %v1098_v46  ;;  %v1107_v51 = vcombine.high %v1082_v39, %v1098_v46  ;;  %v1108_v52 = vcombine.low %v1089_v43, %v1105_v48  ;;  %v1109_v53 = vcombine.high %v1089_v43, %v1105_v48 }
 0x5c5   : > { %1110 = vst.msk [vmem:[#allocation4] sm:$0xff] %vm805_vm4, %v1106_v49  ;;  %1111 = vst.msk [vmem:[#allocation4 + $0x8] sm:$0xff] %vm805_vm4, %v1107_v51 }
 0x5c6   : > { %1112 = vst.msk [vmem:[#allocation4 + $0x10] sm:$0xff] %vm805_vm4, %v1108_v52  ;;  %1113 = vst.msk [vmem:[#allocation4 + $0x18] sm:$0xff] %vm805_vm4, %v1109_v53 }
 0x5cc   : > { %v1128_v7 = vld [vmem:[#allocation4] sm:$0xff]  ;;  %v1129_v4 = vld [vmem:[#allocation4 + $0x8] sm:$0xff] }
 0x5cd   : > { %2488 = vmatpush3.msra.mxu0 %v1128_v7  ;;  %2493 = vmatpush3.msra.mxu1 %v1129_v4  ;;  %v1130_v8 = vld [vmem:[#allocation4 + $0x10] sm:$0xff]  ;;  %v1131_v9 = vld [vmem:[#allocation4 + $0x18] sm:$0xff] }
 0x5ce   : > { %2490 = vmatmul.mubr.msk.f32.vlgmr.msra.gmra.mrb[2].mxu0 %vm805_vm4, %v1499_v3  ;;  %2495 = vmatmul.mubr.msk.f32.vlgmr.msra.gmra.mrb[8].mxu1 %vm805_vm4, %v1500_v6 }
 0x5cf   : > { %2497 = vmatprep.subr.mxu0 %v2878_v13  ;;  %2502 = vmatprep.subr.mxu1 %v2878_v13 }
 0x5d0   : > { %2498 = vmatpush3.msra.mxu0 %v1130_v8  ;;  %2503 = vmatpush3.msra.mxu1 %v1131_v9 }
 0x5d1   : > { %2499 = vmatprep.mubr.msk.f32.mxu0 %vm2877_vm1, %v2878_v13  ;;  %2504 = vmatprep.mubr.msk.f32.mxu1 %vm2877_vm1, %v2878_v13 }
 0x5d2   : > { %2500 = vmatmul.mubr.msk.f32.vlgmr.msra.gmra.mrb[4].mxu0 %vm805_vm4, %v1501_v55  ;;  %2505 = vmatmul.mubr.msk.f32.vlgmr.msra.gmra.mrb[10].mxu1 %vm805_vm4, %v1502_v11 }
 0x5d3   : > { %2554 = vmatprep.subr.bf16.mxu0 %v2876_v10  ;;  %2515 = vmatprep.mubr.msk.f32.mxu0 %vm2877_vm1, %v2878_v13 }
 0x5d4   : > { %2560 = vmatprep.subr.bf16.mxu1 %v2876_v10  ;;  %2526 = vmatprep.mubr.msk.f32.mxu1 %vm2877_vm1, %v2878_v13 }
 0x5d5   : > { %2556 = vmatpush3.bf16.msra.mxu0 %v2555_v60 }
 0x5d6   : > { %2557 = vmatprep.subr.bf16.mxu0 %v2876_v10 }
 0x5d9   : > { %2559 = vmatpush3.bf16.msra.mxu0 %v2558_v36 }
 0x5da   : > { %2566 = vmatprep.subr.bf16.mxu0 %v2876_v10 }
 0x6a1   : > { %v1572_v47 = vpop.f32.mrb[2].mxu0  ;;  %v1645_v41 = vpop.f32.mrb[8].mxu1 }
 0x6a2   : > { %v2491_v42 = vpop.f32.mrb[3].mxu0  ;;  %v2496_v12 = vpop.f32.mrb[9].mxu1 }
 0x6a3   : > { %v2070_v12 = vld [vmem:[%s3516_s8 + $0x18] sm:$0xff] }
 0x6a5   : > { %v1718_v14 = vpop.f32.mrb[4].mxu0  ;;  %v1791_v15 = vpop.f32.mrb[10].mxu1 }
 0x6a6   : > { %v1795_v16 = vcombine.low %v1572_v47, %v1718_v14  ;;  %v1796_v17 = vcombine.high %v1572_v47, %v1718_v14  ;;  %v1811_v18 = vcombine.low %v1645_v41, %v1791_v15  ;;  %v1812_v19 = vcombine.high %v1645_v41, %v1791_v15  ;;  %v2501_v20 = vpop.f32.mrb[5].mxu0  ;;  %v2506_v21 = vpop.f32.mrb[11].mxu1  ;;  %v2069_v41 = vld [vmem:[%s3516_s8 + $0x10] sm:$0xff]  ;;  %v2152_v15 = vld [vmem:[%s3518_s10] sm:$0xff] }
 0x6a7   : > { %v2564_v14 = vpack.c.bf16 %v2070_v12, %v2069_v41  ;;  %v2156_v21 = vld [vmem:[%s3518_s10 + $0x20] sm:$0xff] }
 0x6a8   : > { %v1803_v22 = vrot.slane %v1795_v16, %v3208_v44  ;;  %v1810_v23 = vrot.slane %v1796_v17, %v3208_v44  ;;  %v1819_v24 = vrot.slane %v1811_v18, %v3208_v44  ;;  %v1826_v25 = vrot.slane %v1812_v19, %v3208_v44  ;;  %v2153_v16 = vld [vmem:[%s3518_s10 + $0x8] sm:$0xff]  ;;  %v2154_v17 = vld [vmem:[%s3518_s10 + $0x10] sm:$0xff]  ;;  %v2155_v19 = vld [vmem:[%s3518_s10 + $0x18] sm:$0xff] }
 0x6a9   : > { %v2567_v18 = vpack.c.bf16 %v2153_v16, %v2152_v15  ;;  %v2570_v20 = vpack.c.bf16 %v2155_v19, %v2154_v17 }
 0x6aa   : > { %v1827_v26 = vcombine.low %v1803_v22, %v1819_v24  ;;  %v1828_v27 = vcombine.high %v1803_v22, %v1819_v24  ;;  %v1843_v28 = vcombine.low %v1810_v23, %v1826_v25  ;;  %v1844_v29 = vcombine.high %v1810_v23, %v1826_v25  ;;  %v2157_v22 = vld [vmem:[%s3518_s10 + $0x28] sm:$0xff] }
 0x6ab   : > { %v2573_v23 = vpack.c.bf16 %v2157_v22, %v2156_v21 }
 0x6ac   : > { %v1835_v31 = vrot.slane %v1827_v26, %v3222_v50  ;;  %v1842_v33 = vrot.slane %v1828_v27, %v3222_v50  ;;  %v1851_v34 = vrot.slane %v1843_v28, %v3222_v50  ;;  %v1858_v35 = vrot.slane %v1844_v29, %v3222_v50 }
 0x6ae   : > { %v1863_v37 = vcombine.low %v1835_v31, %v1842_v33  ;;  %v2403_v38 = vcombine.high %v1835_v31, %v1842_v33  ;;  %v1879_v39 = vcombine.low %v1851_v34, %v1858_v35  ;;  %v2404_v43 = vcombine.high %v1851_v34, %v1858_v35 }
 0x6b0   : > { %v1870_v45 = vrot.slane %v1863_v37, %v3208_v44  ;;  %v1878_v46 = vrot.slane %v2403_v38, %v3208_v44  ;;  %v1886_v48 = vrot.slane %v1879_v39, %v3208_v44  ;;  %v1894_v49 = vrot.slane %v2404_v43, %v3208_v44  ;;  %v2407_v37 = vld [vmem:[#allocation8] ss:$0 sm:$0xff] }
 0x6b1   : > { %v2158_v43 = vld [vmem:[%s3518_s10 + $0x30] sm:$0xff] }
 0x6b2   : > { %v1896_v51 = vcombine.high %v1870_v45, %v1878_v46  ;;  %v1912_v52 = vcombine.high %v1886_v48, %v1894_v49  ;;  %v1895_v53 = vcombine.low %v1870_v45, %v1878_v46  ;;  %v1911_v54 = vcombine.low %v1886_v48, %v1894_v49  ;;  %v2159_v45 = vld [vmem:[%s3518_s10 + $0x38] sm:$0xff]  ;;  %v2408_v48 = vld [vmem:[#allocation10] ss:$0 sm:$0xff] }
 0x6b3   : > { %v2576_v46 = vpack.c.bf16 %v2159_v45, %v2158_v43 }
 0x6b4   : > { %v1910_v32 = vrot.slane %v1896_v51, %v3222_v50  ;;  %v1926_v58 = vrot.slane %v1912_v52, %v3222_v50  ;;  %v1903_v59 = vrot.slane %v1895_v53, %v3222_v50  ;;  %v1919_v61 = vrot.slane %v1911_v54, %v3222_v50  ;;  %v2410_v54 = vld [vmem:[%s3550_s21] ss:$0 sm:$0xff] }
 0x6b6   : > { %v1929_v62 = vcombine.low %v1910_v32, %v1926_v58  ;;  %v1928_v63 = vcombine.high %v1903_v59, %v1919_v61  ;;  %v1930_v2 = vcombine.high %v1910_v32, %v1926_v58  ;;  %v1927_v3 = vcombine.low %v1903_v59, %v1919_v61 }
 0x6b8   : > { %1936 = vrot.lane.b32.xlu1 %v1929_v62, %s2887_s14  ;;  %1932 = vrot.lane.b32.xlu0 %v1928_v63, %s2888_s18  ;;  %s3549_s18 = sld [smem:[#allocation17_spill]] }
 0x6bc   : > { %1940 = vrot.lane.b32.xlu0 %v1930_v2, %s2889_s27  ;;  %s3551_s27 = sld [smem:[#allocation20_spill]] }
 0x6be   : > { %v2406_v34 = vld [vmem:[%s3549_s18] ss:$0 sm:$0xff] }
 0x6c2   : > { %s3458_s11 = scalar_lea.hbm %s3551_s27, %s2413_s19 }
 0x72a   : > { %v1933_v44 = vpop.permute.xlu0 %1932  ;;  %v1937_v5 = vpop.permute.xlu1 %1936 }
 0x72b   : > { %v1943_v6 = vsel %vm805_vm4, %v1927_v3, %v1933_v44 }
 0x72c   : > { %v1945_v7 = vsel %vm1944_vm7, %v1943_v6, %v1937_v5 }
 0x72e   : > { %v1941_v1 = vpop.permute.xlu0 %1940 }
 0x72f   : > { %v1947_v4 = vsel %vm1946_vm8, %v1945_v7, %v1941_v1 }
 0x730   : > { %2516 = vmatmul.mubr.msk.f32.vlgmr.msra.gmra.mrb[6].mxu0 %vm543_vm0, %v1947_v4 }
 0x731   : > { %2545 = vmatprep.mubr.msk.f32.mxu0 %vm2877_vm1, %v2878_v13  ;;  %v2067_v13 = vld [vmem:[%s3516_s8] sm:$0xff]  ;;  %2568 = vmatpush3.bf16.msra.mxu0 %v2567_v18 }
 0x732   : > { %2569 = vmatprep.subr.bf16.mxu0 %v2876_v10 }
 0x735   : > { %2571 = vmatpush3.bf16.msra.mxu0 %v2570_v20 }
 0x736   : > { %2572 = vmatprep.subr.bf16.mxu0 %v2876_v10 }
 0x739   : > { %2574 = vmatpush3.bf16.msra.mxu0 %v2573_v23 }
 0x73a   : > { %2575 = vmatprep.subr.bf16.mxu0 %v2876_v10 }
 0x73d   : > { %2577 = vmatpush3.bf16.msra.mxu0 %v2576_v46 }
 0x803   : > { %v2022_v50 = vpop.f32.mrb[6].mxu0 }
 0x804   : > { %v3398_v8 = vadd.f32 %v2022_v50, %v3159_v0  ;;  %v2517_v9 = vpop.f32.mrb[7].mxu0  ;;  %v2068_v0 = vld [vmem:[%s3516_s8 + $0x8] sm:$0xff] }
 0x805   : > { %v2561_v42 = vpack.c.bf16 %v2068_v0, %v2067_v13 }
 0x806   : > { %v2029_v55 = vsel %vm543_vm0, %v3398_v8, 0.0 }
 0x807   : > { %2030 = vadd.xlane.f32.xlu1 %v2029_v55  ;;  %2562 = vmatpush3.bf16.msra.mxu1 %v2561_v42 }
 0x808   : > { %2563 = vmatprep.subr.bf16.mxu1 %v2876_v10 }
 0x80b   : > { %2565 = vmatpush3.bf16.msra.mxu1 %v2564_v14 }
 0x894   : > { %v2031_v11 = vpop.xlane.xlu1 %2030 }
 0x895   : > { %v2033_v56 = vmul.f32 0.03125, %v2031_v11 }
 0x897   : > { %v2034_v57 = vsub.f32 %v3398_v8, %v2033_v56 }
 0x899   : > { %v2035_v60 = vmul.f32 %v2034_v57, %v2034_v57  ;;  %v2053_v10 = vmul.f32 %v2406_v34, %v2034_v57 }
 0x89b   : > { %v2036_v47 = vsel %vm543_vm0, %v2035_v60, 0.0 }
 0x89c   : > { %2037 = vadd.xlane.f32.xlu0 %v2036_v47 }
 0x929   : > { %v2038_v24 = vpop.xlane.xlu0 %2037 }
 0x92a   : > { %v2039_v25 = vmul.f32 0.032258064, %v2038_v24 }
 0x92c   : > { %2695 = vrsqrt.f32 %v2039_v25  ;;  %vm2042_vm9 = vcmp.eq.f32.partialorder %v2039_v25, inf  ;;  %v2045_v28 = vand.u32 2147483648, %v2039_v25  ;;  %vm2044_vm10 = vcmp.eq.f32.partialorder %v2039_v25, 0.0 }
 0x936   : > { %v2696_v26 = vpop.eup %2695 }
 0x937   : > { %v2041_v27 = vmul.f32 %v2696_v26, %v2039_v25 }
 0x939   : > { %v2043_v29 = vsel %vm2042_vm9, %v2039_v25, %v2041_v27 }
 0x93a   : > { %v2046_v30 = vsel %vm2044_vm10, %v2045_v28, %v2043_v29 }
 0x93b   : > { %v2054_v40 = vadd.f32 1e-06, %v2046_v30 }
 0x93d   : > { %2697 = vrcp.f32 %v2054_v40 }
 0x947   : > { %v2698_v31 = vpop.eup %2697 }
 0x948   : > { %v2056_v33 = vmul.f32 %v2698_v31, %v2054_v40 }
 0x94a   : > { %v2057_v35 = vsub.f32 2.0, %v2056_v33 }
 0x94c   : > { %v2058_v36 = vmul.f32 %v2698_v31, %v2057_v35 }
 0x94e   : > { %v2059_v38 = vmul.f32 %v2058_v36, %v2053_v10 }
 0x950   : > { %v2066_v39 = vadd.f32 %v2407_v37, %v2059_v38 }
 0x952   : > { %2527 = vmatmul.mubr.msk.f32.vlgmr.msra.gmra.mrb[12].mxu1 %vm543_vm0, %v2066_v39 }
 0xa25   : > { %v2147_v49 = vpop.f32.mrb[12].mxu1 }
 0xa26   : > { %v2148_v51 = vadd.f32 %v2408_v48, %v2147_v49  ;;  %v2528_v52 = vpop.f32.mrb[13].mxu1 }
 0xa28   : > { %v2151_v53 = vmax.f32 %v2148_v51, 0.0 }
 0xa2a   : > { %2546 = vmatmul.mubr.msk.f32.vlgmr.msra.gmra.mrb[8].mxu0 %vm2167_vm11, %v2151_v53 }
 0xafd   : > { %v2237_v32 = vpop.f32.mrb[8].mxu0 }
 0xafe   : > { %v2238_v58 = vadd.f32 %v2410_v54, %v2237_v32  ;;  %v2547_v59 = vpop.f32.mrb[9].mxu0 }
 0xb00   : > { %v2241_v61 = vadd.f32 %v2238_v58, %v3398_v8 }
 0xb02   : > { %2242 = vst.msk [vmem:[%s532_s23] sm:$0xff] %vm543_vm0, %v2241_v61 }
 0xb03   : > { %2798 = shalt.err (!%p2795_p10)
}
 0xb04   : > { %s2799_s24 = scalar_lea.hbm %s3458_s11, 128  ;;  %s2803_s19 = scalar_lea.hbm %s3551_s27, 256 }
 0xb05   : > { %p2800_p13 = scmp.ne.s32.totalorder %s3458_s11, %s2799_s24  ;;  %p2804_p3 = scmp.lt.u32.totalorder %s3458_s11, %s3551_s27 }
 0xb06   : > { %p2805_p11 = scmp.lt.u32.totalorder %s2803_s19, %s2799_s24  ;;  %p2807_p4 = scmp.lt.u32.totalorder %s2799_s24, %s3458_s11 }
 0xb07   : > { %p2801_p9 = pnand %p2800_p13, %p3093_p8 }
 0xb08   : > { %p2806_p1 = por %p2805_p11, %p2804_p3 }
 0xb09   : > { %p2802_p7 = pneg %p2801_p9 }
 0xb0a   : > { %p2808_p2 = por %p2807_p4, %p2806_p1 }
 0xb0c   : > { %p2809_p6 = pnand %p2808_p2, %p2802_p7 }
 0xb0e   : > { %2812 = shalt.err (!%p2809_p6)
}
 0xb0f   : > { %2588 = dma.vmem_to_hbm [thread:$0]  (%p3093_p8), %s3460_s13, 128, %s3458_s11, %s2244_s16  }
 0xb10 PF: > { %s3552_s18 = sld [smem:[#allocation15_spill]]  ;;  %s3553_s6 = sld [smem:[#allocation16_spill]] }
 0xb11   : > { %p3555_p0 = scmp.ge.s32.totalorder %s2871_s17, 2 }
 0xb16   : > { %s2270_s25 = sand.u32 1, %s3552_s18   ;;  %p3554_p12 = scmp.ne.s32.totalorder %s3553_s6, 0 }
 0xb17   : > { %s2271_s20 = scalar_lea.sflag [#allocation7], %s2270_s25 }
 0xb18   : > { %p2602_p5 = pnand %p3555_p0, %p3554_p12 }
 0xb1a   : > { %2846 = dma.done.wait (!%p2602_p5), %s2271_s20, 128  }
 0xb1b   : > { %2848 = vsyncadd (!%p2602_p5), %s2271_s20, 4294967168  ;;  %s31_s17 = sadd.s32 1, %s2871_s17   ;;  %s3556_s28 = smov %s3102_s29 }
 0xb1c   : > { %p28_p10 = scmp.ge.s32.totalorder %s31_s17, 4   ;;  %s3557_s29 = smov %s2855_s30 }
 0xb1d   : > { %s3558_s30 = smov %s2859_s15  ;;  %s3559_s15 = smov %s3556_s28 }
 0xb1e   : > { %s3560_s16 = smov %s2867_s12  ;;  %s3561_s12 = smov %s3563_s22 }
 0xb1f   :  { %30 = sbr.rel (!%p28_p10) target bundleno = 12 (0xc), region = 138 }
 0xb26   :  { %2276 = vsyncpa [#allocation6], 1 }
 0xb27   :  { %2278 = vsyncpa [#allocation6 + $0x1], 1 }
 0xb28   :  { %2279 = vsyncpa [#allocation9], 1 }
 0xb29   :  { %2280 = vsyncpa [#allocation7], 1 }
 0xb2a   :  { %2282 = vsyncpa [#allocation7 + $0x1], 1 }

</bundles_post_ra>
